<compile_context>
chip_gen: v7x
topology: tpu7x:2x2x1
jax: 0.10.0
libtpu: 0.0.40
codegen_flags: <defaults>
</compile_context>

<pallas_src>
import functools
import math

import jax
import jax.numpy as jnp
from jax import lax
from jax.experimental import pallas as pl
from jax.experimental.pallas import tpu as pltpu

EPS = 1e-5  # torch.nn.LayerNorm default eps


def _layernorm(x, w, b):
    """LayerNorm over last dim (f32)."""
    mu = jnp.mean(x, axis=-1, keepdims=True)
    xc = x - mu
    var = jnp.mean(xc * xc, axis=-1, keepdims=True)
    return xc * lax.rsqrt(var + EPS) * w + b


def _bf16(a):
    return a.astype(jnp.bfloat16)


# ---------------------------------------------------------------------------
# Fused kernel: embed + ln_pre (at layer 0) + all transformer blocks.
# grid = (batch_chunks, n_layers); x carried across the layer axis in VMEM.
# ---------------------------------------------------------------------------
def _transformer_kernel(x_ref, pos_ref, lnpre_w_ref, lnpre_b_ref,
                        ln1_w_ref, ln1_b_ref, wqkv_ref, wo_ref,
                        lnpost_w_ref, lnpost_b_ref,
                        ln2_w_ref, ln2_b_ref, w1_ref,
                        lnm_w_ref, lnm_b_ref, w2_ref,
                        o_ref, xs_ref, *, n_heads):
    layer = pl.program_id(1)
    bc, t, d = x_ref.shape
    r = bc * t
    hd = d // n_heads

    # ---- layer 0: x + pos_embed -> (embed dropout p=0) -> ln_pre ----
    @pl.when(layer == 0)
    def _():
        x0 = (x_ref[...] + pos_ref[...]).reshape(r, d)       # (R, D)
        xs_ref[...] = _layernorm(x0, lnpre_w_ref[...], lnpre_b_ref[...])

    x = xs_ref[...]                                           # (R, D) f32

    # ---- multi-head self attention (bias-free, no mask, attn_drop=0) ----
    xn = _layernorm(x, ln1_w_ref[0], ln1_b_ref[0])
    # fused QKV projection: (R, D) @ (D, 3D); 1/sqrt(hd) pre-folded into Q cols.
    qkv = jnp.dot(_bf16(xn), wqkv_ref[0], preferred_element_type=jnp.float32)
    wo = wo_ref[0]                                            # (D, D) bf16
    attn = jnp.zeros((r, d), jnp.float32)
    for h in range(n_heads):
        qh = _bf16(qkv[:, h * hd:(h + 1) * hd]).reshape(bc, t, hd)
        kh = _bf16(qkv[:, d + h * hd:d + (h + 1) * hd]).reshape(bc, t, hd)
        vh = _bf16(qkv[:, 2 * d + h * hd:2 * d + (h + 1) * hd]).reshape(bc, t, hd)
        # contract head-dim directly (no explicit K transpose), batched over chunk
        s = jnp.einsum('bqh,bkh->bqk', qh, kh,
                       preferred_element_type=jnp.float32)    # (bc, T, T) f32
        s = s - jnp.max(s, axis=-1, keepdims=True)
        p = jnp.exp(s)
        p = p * pl.reciprocal(jnp.sum(p, axis=-1, keepdims=True), approx=True)
        pv = jnp.einsum('bqk,bkh->bqh', _bf16(p), vh,
                        preferred_element_type=jnp.float32)   # (bc, T, hd)
        # fold the out-projection in per head: concat(pv) @ Wo == sum_h pv_h @ Wo_h
        attn = attn + jnp.dot(_bf16(pv.reshape(r, hd)),
                              wo[h * hd:(h + 1) * hd, :],
                              preferred_element_type=jnp.float32)
    attn = _layernorm(attn, lnpost_w_ref[0], lnpost_b_ref[0])
    x = x + attn

    # ---- SwiGLU MLP (resid dropout p=0 -> identity) ----
    xn2 = _layernorm(x, ln2_w_ref[0], ln2_b_ref[0])
    h12 = jnp.dot(_bf16(xn2), w1_ref[0],
                  preferred_element_type=jnp.float32)         # (R, 2M) = [val | gate]
    m = h12.shape[-1] // 2
    val = h12[:, :m]
    gate = h12[:, m:]
    swi = gate * jax.nn.sigmoid(gate) * val                   # F.silu(gate) * val
    swi = _layernorm(swi, lnm_w_ref[0], lnm_b_ref[0])         # LayerNorm(d_model*mlp_scale)
    mlp = jnp.dot(_bf16(swi), w2_ref[0],
                  preferred_element_type=jnp.float32)         # (R, D)
    x = x + mlp

    xs_ref[...] = x                                           # carry to next layer

    @pl.when(layer == pl.num_programs(1) - 1)
    def _():
        o_ref[...] = x.reshape(bc, t, d)


# ---------------------------------------------------------------------------
# Wrapper: single pallas_call over (batch_chunks, layers)
# ---------------------------------------------------------------------------
def _vmem_limit_bytes():
    """~75% of physical VMEM: ~96 MiB on v5e/v6e (128 MiB), ~48 MiB on v7x (64 MiB)."""
    cap = 128 * 1024 * 1024
    try:
        info = pltpu.get_tpu_info()
        cap = int(getattr(info, "vmem_capacity_bytes", cap) or cap)
    except Exception:
        pass
    return (cap // 4) * 3


def transformer_forward(x, params, n_heads, *, batch_chunk=None):
    (pos, ln_pre_w, ln_pre_b,
     ln1_w, ln1_b, w_qkv, w_o, lnpost_w, lnpost_b,
     ln2_w, ln2_b, w1, lnm_w, lnm_b, w2) = params

    B, T, D = x.shape
    L = w_qkv.shape[0]
    M = w2.shape[1]
    pos = pos[:, :T, :]

    if batch_chunk is None:
        # Fold as many batch rows as possible into each grid step so per-layer
        # weights are streamed once per chunk (not once per batch element), but:
        #  - keep >=2 chunks whenever B > 1 so the "parallel" chunk axis can
        #    feed both v7x TensorCores;
        #  - cap the resident f32 activation slab at ~4 MiB.
        cap_rows = max(1, (4 << 20) // (T * D * 4))
        batch_chunk = 1
        for c in range(1, B + 1):
            if (B % c) or (c > cap_rows):
                continue
            if B // c >= 2 or B == 1:
                batch_chunk = c
    assert B % batch_chunk == 0
    n_chunks = B // batch_chunk

    bmap = lambda c, l: (c, 0, 0)       # chunk-indexed (x, out)
    cmap3 = lambda c, l: (0, 0, 0)      # constant 3-D (pos)
    cmap2 = lambda c, l: (0, 0)         # constant 2-D (ln_pre)
    lmap3 = lambda c, l: (l, 0, 0)      # per-layer stacked weights

    in_specs = [
        pl.BlockSpec((batch_chunk, T, D), bmap),    # x
        pl.BlockSpec((1, T, D), cmap3),             # pos_embed
        pl.BlockSpec((1, D), cmap2),                # ln_pre w
        pl.BlockSpec((1, D), cmap2),                # ln_pre b
        pl.BlockSpec((1, 1, D), lmap3),             # pre_attn LN w
        pl.BlockSpec((1, 1, D), lmap3),             # pre_attn LN b
        pl.BlockSpec((1, D, 3 * D), lmap3),         # fused QKV weight (bf16)
        pl.BlockSpec((1, D, D), lmap3),             # out_proj weight (bf16)
        pl.BlockSpec((1, 1, D), lmap3),             # post_attn LN w
        pl.BlockSpec((1, 1, D), lmap3),             # post_attn LN b
        pl.BlockSpec((1, 1, D), lmap3),             # pre_mlp LN w
        pl.BlockSpec((1, 1, D), lmap3),             # pre_mlp LN b
        pl.BlockSpec((1, D, 2 * M), lmap3),         # fused W1 [val|gate] (bf16)
        pl.BlockSpec((1, 1, M), lmap3),             # mid LN w
        pl.BlockSpec((1, 1, M), lmap3),             # mid LN b
        pl.BlockSpec((1, M, D), lmap3),             # W2 (bf16)
    ]
    # TODO(synk): for v7x at D>=1024 the whole-layer W1/W2 blocks exceed 64 MiB
    # VMEM when double-buffered; add an M-tiling grid axis (or an inner
    # pltpu.emit_pipeline over M) for those widths.
    # TODO(synk): for real ViT sequence lengths (e.g. T=197) pad T to a multiple
    # of 128 with a key-side mask for lane-dense score tiles.

    kernel = functools.partial(_transformer_kernel, n_heads=n_heads)
    return pl.pallas_call(
        kernel,
        out_shape=jax.ShapeDtypeStruct((B, T, D), jnp.float32),
        grid=(n_chunks, L),
        in_specs=in_specs,
        out_specs=pl.BlockSpec((batch_chunk, T, D), bmap),
        scratch_shapes=[pltpu.VMEM((batch_chunk * T, D), jnp.float32)],
        compiler_params=pltpu.CompilerParams(
            dimension_semantics=("parallel", "arbitrary"),
            vmem_limit_bytes=_vmem_limit_bytes(),
        ),
    )(x, pos, ln_pre_w, ln_pre_b,
      ln1_w, ln1_b, w_qkv, w_o, lnpost_w, lnpost_b,
      ln2_w, ln2_b, w1, lnm_w, lnm_b, w2)


# ---------------------------------------------------------------------------
# Deterministic parameter init (shapes from the PyTorch __init__)
# Per-layer weights stacked along a leading layer axis; matmul weights in bf16.
# ---------------------------------------------------------------------------
def init_params(key, n_context, n_embed, n_heads, n_layers, mlp_scale,
                wdtype=jnp.bfloat16):
    D, H = n_embed, n_heads
    hd = D // H
    M = D * mlp_scale

    keys = jax.random.split(key, 1 + n_layers)
    pos_embed = jax.random.normal(keys[0], (1, n_context, D), jnp.float32)
    ln_pre_w = jnp.ones((1, D), jnp.float32)
    ln_pre_b = jnp.zeros((1, D), jnp.float32)

    def lin(k, shape):  # (in, out) layout, xavier-ish scale
        return jax.random.normal(k, shape, jnp.float32) * (1.0 / math.sqrt(shape[0]))

    wqkv_l, wo_l, w1_l, w2_l = [], [], [], []
    for l in range(n_layers):
        lk = jax.random.split(keys[1 + l], 7)
        # MHA in_proj (bias=False); fold 1/sqrt(hd) attention scale into Wq
        wq = lin(lk[0], (D, D)) * (1.0 / math.sqrt(hd))
        wk = lin(lk[1], (D, D))
        wv = lin(lk[2], (D, D))
        wqkv_l.append(jnp.concatenate([wq, wk, wv], axis=-1))      # (D, 3D)
        wo_l.append(lin(lk[3], (D, D)))                            # out_proj.weight.T
        w1v = lin(lk[4], (D, M))                                   # SwiGLU "x" chunk
        w1g = lin(lk[5], (D, M))                                   # SwiGLU gate chunk
        w1_l.append(jnp.concatenate([w1v, w1g], axis=-1))          # (D, 2M)
        w2_l.append(lin(lk[6], (M, D)))

    w_qkv = jnp.stack(wqkv_l).astype(wdtype)      # (L, D, 3D)
    w_o = jnp.stack(wo_l).astype(wdtype)          # (L, D, D)
    w1 = jnp.stack(w1_l).astype(wdtype)           # (L, D, 2M)
    w2 = jnp.stack(w2_l).astype(wdtype)           # (L, M, D)

    ones_D = jnp.ones((n_layers, 1, D), jnp.float32)
    zeros_D = jnp.zeros((n_layers, 1, D), jnp.float32)
    ones_M = jnp.ones((n_layers, 1, M), jnp.float32)
    zeros_M = jnp.zeros((n_layers, 1, M), jnp.float32)

    return (pos_embed, ln_pre_w, ln_pre_b,
            ones_D, zeros_D,          # pre_attn LN
            w_qkv, w_o,
            ones_D, zeros_D,          # post_attn LN
            ones_D, zeros_D,          # pre_mlp LN
            w1,
            ones_M, zeros_M,          # mid (M) LN
            w2)


# ---------------------------------------------------------------------------
# Pure-JAX reference (same bf16 weight/activation casts) for a sanity check.
# ---------------------------------------------------------------------------
def transformer_reference(x, params, n_heads):
    (pos, ln_pre_w, ln_pre_b,
     ln1_w, ln1_b, w_qkv, w_o, lnpost_w, lnpost_b,
     ln2_w, ln2_b, w1, lnm_w, lnm_b, w2) = params
    B, T, D = x.shape
    H = n_heads
    hd = D // H
    L = w_qkv.shape[0]

    def ln(v, w, b):
        mu = jnp.mean(v, -1, keepdims=True)
        var = jnp.mean((v - mu) ** 2, -1, keepdims=True)
        return (v - mu) / jnp.sqrt(var + EPS) * w + b

    def mm(a, w):
        return jnp.einsum('btd,df->btf', a.astype(jnp.bfloat16), w,
                          preferred_element_type=jnp.float32)

    h = ln(x + pos[:, :T, :], ln_pre_w[0], ln_pre_b[0])
    for l in range(L):
        xn = ln(h, ln1_w[l, 0], ln1_b[l, 0])
        qkv = mm(xn, w_qkv[l])
        q = qkv[..., :D].reshape(B, T, H, hd)
        k = qkv[..., D:2 * D].reshape(B, T, H, hd)
        v = qkv[..., 2 * D:].reshape(B, T, H, hd)
        s = jnp.einsum('bthd,bshd->bhts', q.astype(jnp.bfloat16),
                       k.astype(jnp.bfloat16), preferred_element_type=jnp.float32)
        p = jax.nn.softmax(s, axis=-1)
        pv = jnp.einsum('bhts,bshd->bthd', p.astype(jnp.bfloat16),
                        v.astype(jnp.bfloat16),
                        preferred_element_type=jnp.float32).reshape(B, T, D)
        attn = mm(pv, w_o[l])
        h = h + ln(attn, lnpost_w[l, 0], lnpost_b[l, 0])
        xn2 = ln(h, ln2_w[l, 0], ln2_b[l, 0])
        h12 = mm(xn2, w1[l])
        M = h12.shape[-1] // 2
        val, gate = h12[..., :M], h12[..., M:]
        swi = ln(jax.nn.silu(gate) * val, lnm_w[l, 0], lnm_b[l, 0])
        h = h + mm(swi, w2[l])
    return h


if __name__ == "__main__":
    B, n_context, n_embed, n_heads, n_layers, mlp_scale = 2, 8, 32, 4, 2, 4

    key = jax.random.PRNGKey(0)
    kx, kp = jax.random.split(key)
    x = jax.random.normal(kx, (B, n_context, n_embed), jnp.float32)
    params = init_params(kp, n_context, n_embed, n_heads, n_layers, mlp_scale)

    out = transformer_forward(x, params, n_heads)
    out = jax.block_until_ready(out)
    assert out.shape == (B, n_context, n_embed)
    assert bool(jnp.all(jnp.isfinite(out)))

    ref = transformer_reference(x, params, n_heads)
    err = float(jnp.max(jnp.abs(out - ref)))
    # bf16 matmuls + approx-reciprocal softmax: loose tolerance vs f32 reference.
    assert err < 1e-1, f"max abs error vs reference: {err}"

    # TODO(synk): train-mode dropout (embed/attn/resid with p>0) is not
    # implemented; the module defaults all of them to p=0 (identity).
    print("KERNEL_OK")
</pallas_src>

<mosaic_0001>
module attributes {stable_mosaic.version = 11 : i64} {
  func.func @_transformer_kernel(%arg0: i32, %arg1: i32, %arg2: memref<1x8x32xf32, #tpu.memory_space<vmem>>, %arg3: memref<1x8x32xf32, #tpu.memory_space<vmem>>, %arg4: memref<1x32xf32, #tpu.memory_space<vmem>>, %arg5: memref<1x32xf32, #tpu.memory_space<vmem>>, %arg6: memref<1x1x32xf32, #tpu.memory_space<vmem>>, %arg7: memref<1x1x32xf32, #tpu.memory_space<vmem>>, %arg8: memref<1x32x96xbf16, #tpu.memory_space<vmem>>, %arg9: memref<1x32x32xbf16, #tpu.memory_space<vmem>>, %arg10: memref<1x1x32xf32, #tpu.memory_space<vmem>>, %arg11: memref<1x1x32xf32, #tpu.memory_space<vmem>>, %arg12: memref<1x1x32xf32, #tpu.memory_space<vmem>>, %arg13: memref<1x1x32xf32, #tpu.memory_space<vmem>>, %arg14: memref<1x32x256xbf16, #tpu.memory_space<vmem>>, %arg15: memref<1x1x128xf32, #tpu.memory_space<vmem>>, %arg16: memref<1x1x128xf32, #tpu.memory_space<vmem>>, %arg17: memref<1x128x32xbf16, #tpu.memory_space<vmem>>, %arg18: memref<1x8x32xf32, #tpu.memory_space<vmem>>, %arg19: memref<8x32xf32, #tpu.memory_space<vmem>>) attributes {dimension_semantics = [#tpu.dimension_semantics<parallel>, #tpu.dimension_semantics<arbitrary>], iteration_bounds = array<i64: 2, 2>, scalar_prefetch = 0 : i64, scratch_operands = 1 : i64, tpu.core_type = #tpu.core_type<tc>, window_params = [{transform_indices = @transform_0, window_bounds = array<i64: 1, 8, 32>}, {pipeline_mode = #tpu.pipeline_mode<synchronous>, transform_indices = @transform_1, window_bounds = array<i64: 1, 8, 32>}, {pipeline_mode = #tpu.pipeline_mode<synchronous>, transform_indices = @transform_2, window_bounds = array<i64: 1, 32>}, {pipeline_mode = #tpu.pipeline_mode<synchronous>, transform_indices = @transform_3, window_bounds = array<i64: 1, 32>}, {transform_indices = @transform_4, window_bounds = array<i64: 1, 1, 32>}, {transform_indices = @transform_5, window_bounds = array<i64: 1, 1, 32>}, {transform_indices = @transform_6, window_bounds = array<i64: 1, 32, 96>}, {transform_indices = @transform_7, window_bounds = array<i64: 1, 32, 32>}, {transform_indices = @transform_8, window_bounds = array<i64: 1, 1, 32>}, {transform_indices = @transform_9, window_bounds = array<i64: 1, 1, 32>}, {transform_indices = @transform_10, window_bounds = array<i64: 1, 1, 32>}, {transform_indices = @transform_11, window_bounds = array<i64: 1, 1, 32>}, {transform_indices = @transform_12, window_bounds = array<i64: 1, 32, 256>}, {transform_indices = @transform_13, window_bounds = array<i64: 1, 1, 128>}, {transform_indices = @transform_14, window_bounds = array<i64: 1, 1, 128>}, {transform_indices = @transform_15, window_bounds = array<i64: 1, 128, 32>}, {transform_indices = @transform_16, window_bounds = array<i64: 1, 8, 32>}]} {
    %c0_i32 = arith.constant 0 : i32
    %0 = arith.cmpi eq, %arg1, %c0_i32 : i32
    %1 = arith.extui %0 : i1 to i32
    %c0_i32_0 = arith.constant 0 : i32
    %2 = arith.cmpi ne, %1, %c0_i32_0 : i32
    scf.if %2 {
      %c0_85 = arith.constant 0 : index
      %c0_86 = arith.constant 0 : index
      %c0_87 = arith.constant 0 : index
      %238 = vector.load %arg2[%c0_85, %c0_86, %c0_87] : memref<1x8x32xf32, #tpu.memory_space<vmem>>, vector<1x8x32xf32>
      %c0_88 = arith.constant 0 : index
      %c0_89 = arith.constant 0 : index
      %c0_90 = arith.constant 0 : index
      %239 = vector.load %arg3[%c0_88, %c0_89, %c0_90] : memref<1x8x32xf32, #tpu.memory_space<vmem>>, vector<1x8x32xf32>
      %240 = arith.addf %238, %239 : vector<1x8x32xf32>
      %241 = vector.shape_cast %240 : vector<1x8x32xf32> to vector<8x32xf32>
      %c0_91 = arith.constant 0 : index
      %c0_92 = arith.constant 0 : index
      %242 = vector.load %arg4[%c0_91, %c0_92] : memref<1x32xf32, #tpu.memory_space<vmem>>, vector<1x32xf32>
      %c0_93 = arith.constant 0 : index
      %c0_94 = arith.constant 0 : index
      %243 = vector.load %arg5[%c0_93, %c0_94] : memref<1x32xf32, #tpu.memory_space<vmem>>, vector<1x32xf32>
      %cst_95 = arith.constant dense<0.000000e+00> : vector<8xf32>
      %244 = vector.multi_reduction <add>, %241, %cst_95 [1] : vector<8x32xf32> to vector<8xf32>
      %245 = vector.shape_cast %244 : vector<8xf32> to vector<8x1xf32>
      %cst_96 = arith.constant 3.200000e+01 : f32
      %246 = vector.broadcast %cst_96 : f32 to vector<8x1xf32>
      %247 = arith.divf %245, %246 : vector<8x1xf32>
      %248 = vector.broadcast %247 : vector<8x1xf32> to vector<8x32xf32>
      %249 = arith.subf %241, %248 : vector<8x32xf32>
      %250 = arith.mulf %249, %249 : vector<8x32xf32>
      %cst_97 = arith.constant dense<0.000000e+00> : vector<8xf32>
      %251 = vector.multi_reduction <add>, %250, %cst_97 [1] : vector<8x32xf32> to vector<8xf32>
      %252 = vector.shape_cast %251 : vector<8xf32> to vector<8x1xf32>
      %cst_98 = arith.constant 3.200000e+01 : f32
      %253 = vector.broadcast %cst_98 : f32 to vector<8x1xf32>
      %254 = arith.divf %252, %253 : vector<8x1xf32>
      %cst_99 = arith.constant 9.99999974E-6 : f32
      %255 = vector.broadcast %cst_99 : f32 to vector<8x1xf32>
      %256 = arith.addf %254, %255 : vector<8x1xf32>
      %257 = math.rsqrt %256 : vector<8x1xf32>
      %258 = vector.broadcast %257 : vector<8x1xf32> to vector<8x32xf32>
      %259 = arith.mulf %249, %258 : vector<8x32xf32>
      %260 = vector.broadcast %242 : vector<1x32xf32> to vector<8x32xf32>
      %261 = arith.mulf %259, %260 : vector<8x32xf32>
      %262 = vector.broadcast %243 : vector<1x32xf32> to vector<8x32xf32>
      %263 = arith.addf %261, %262 : vector<8x32xf32>
      %c0_100 = arith.constant 0 : index
      %c0_101 = arith.constant 0 : index
      %264 = vector.load %arg19[%c0_100, %c0_101] : memref<8x32xf32, #tpu.memory_space<vmem>>, vector<8x32xf32>
      tpu.vector_store %arg19[%c0_100, %c0_101], %263 {strides = array<i32>} : memref<8x32xf32, #tpu.memory_space<vmem>>, vector<8x32xf32>,
    } else {
    }
    %c0 = arith.constant 0 : index
    %c0_1 = arith.constant 0 : index
    %3 = vector.load %arg19[%c0, %c0_1] : memref<8x32xf32, #tpu.memory_space<vmem>>, vector<8x32xf32>
    %c0_2 = arith.constant 0 : index
    %c0_3 = arith.constant 0 : index
    %c0_4 = arith.constant 0 : index
    %4 = vector.load %arg6[%c0_2, %c0_3, %c0_4] : memref<1x1x32xf32, #tpu.memory_space<vmem>>, vector<1x1x32xf32>
    %5 = vector.shape_cast %4 : vector<1x1x32xf32> to vector<1x32xf32>
    %c0_5 = arith.constant 0 : index
    %c0_6 = arith.constant 0 : index
    %c0_7 = arith.constant 0 : index
    %6 = vector.load %arg7[%c0_5, %c0_6, %c0_7] : memref<1x1x32xf32, #tpu.memory_space<vmem>>, vector<1x1x32xf32>
    %7 = vector.shape_cast %6 : vector<1x1x32xf32> to vector<1x32xf32>
    %cst = arith.constant dense<0.000000e+00> : vector<8xf32>
    %8 = vector.multi_reduction <add>, %3, %cst [1] : vector<8x32xf32> to vector<8xf32>
    %9 = vector.shape_cast %8 : vector<8xf32> to vector<8x1xf32>
    %cst_8 = arith.constant 3.200000e+01 : f32
    %10 = vector.broadcast %cst_8 : f32 to vector<8x1xf32>
    %11 = arith.divf %9, %10 : vector<8x1xf32>
    %12 = vector.broadcast %11 : vector<8x1xf32> to vector<8x32xf32>
    %13 = arith.subf %3, %12 : vector<8x32xf32>
    %14 = arith.mulf %13, %13 : vector<8x32xf32>
    %cst_9 = arith.constant dense<0.000000e+00> : vector<8xf32>
    %15 = vector.multi_reduction <add>, %14, %cst_9 [1] : vector<8x32xf32> to vector<8xf32>
    %16 = vector.shape_cast %15 : vector<8xf32> to vector<8x1xf32>
    %cst_10 = arith.constant 3.200000e+01 : f32
    %17 = vector.broadcast %cst_10 : f32 to vector<8x1xf32>
    %18 = arith.divf %16, %17 : vector<8x1xf32>
    %cst_11 = arith.constant 9.99999974E-6 : f32
    %19 = vector.broadcast %cst_11 : f32 to vector<8x1xf32>
    %20 = arith.addf %18, %19 : vector<8x1xf32>
    %21 = math.rsqrt %20 : vector<8x1xf32>
    %22 = vector.broadcast %21 : vector<8x1xf32> to vector<8x32xf32>
    %23 = arith.mulf %13, %22 : vector<8x32xf32>
    %24 = vector.broadcast %5 : vector<1x32xf32> to vector<8x32xf32>
    %25 = arith.mulf %23, %24 : vector<8x32xf32>
    %26 = vector.broadcast %7 : vector<1x32xf32> to vector<8x32xf32>
    %27 = arith.addf %25, %26 : vector<8x32xf32>
    %28 = arith.truncf %27 : vector<8x32xf32> to vector<8x32xbf16>
    %c0_12 = arith.constant 0 : index
    %c0_13 = arith.constant 0 : index
    %c0_14 = arith.constant 0 : index
    %29 = vector.load %arg8[%c0_12, %c0_13, %c0_14] : memref<1x32x96xbf16, #tpu.memory_space<vmem>>, vector<1x32x96xbf16>
    %30 = vector.shape_cast %29 : vector<1x32x96xbf16> to vector<32x96xbf16>
    %cst_15 = arith.constant dense<0.000000e+00> : vector<8x96xf32>
    %31 = tpu.matmul %28, %30, %cst_15 {dimension_numbers = #tpu.dot_dimension_numbers<[1], [0], [0], [1], [0, 0, 1, 1], [], []>} : vector<8x32xbf16>, vector<32x96xbf16>, vector<8x96xf32> -> vector<8x96xf32>
    %c0_16 = arith.constant 0 : index
    %c0_17 = arith.constant 0 : index
    %c0_18 = arith.constant 0 : index
    %32 = vector.load %arg9[%c0_16, %c0_17, %c0_18] : memref<1x32x32xbf16, #tpu.memory_space<vmem>>, vector<1x32x32xbf16>
    %33 = vector.shape_cast %32 : vector<1x32x32xbf16> to vector<32x32xbf16>
    %cst_19 = arith.constant 0.000000e+00 : f32
    %34 = vector.broadcast %cst_19 : f32 to vector<8x32xf32>
    %35 = vector.extract_strided_slice %31 {offsets = [0, 0], sizes = [8, 8], strides = [1, 1]} : vector<8x96xf32> to vector<8x8xf32>
    %36 = arith.truncf %35 : vector<8x8xf32> to vector<8x8xbf16>
    %37 = vector.shape_cast %36 : vector<8x8xbf16> to vector<1x8x8xbf16>
    %38 = vector.extract_strided_slice %31 {offsets = [0, 32], sizes = [8, 8], strides = [1, 1]} : vector<8x96xf32> to vector<8x8xf32>
    %39 = arith.truncf %38 : vector<8x8xf32> to vector<8x8xbf16>
    %40 = vector.shape_cast %39 : vector<8x8xbf16> to vector<1x8x8xbf16>
    %41 = vector.extract_strided_slice %31 {offsets = [0, 64], sizes = [8, 8], strides = [1, 1]} : vector<8x96xf32> to vector<8x8xf32>
    %42 = arith.truncf %41 : vector<8x8xf32> to vector<8x8xbf16>
    %43 = vector.shape_cast %42 : vector<8x8xbf16> to vector<1x8x8xbf16>
    "tpu.trace_start"() <{level = 10 : i32, message = "bqh,bkh->bqk"}> : () -> ()
    %cst_20 = arith.constant dense<0.000000e+00> : vector<1x8x8xf32>
    %44 = tpu.matmul %37, %40, %cst_20 {dimension_numbers = #tpu.dot_dimension_numbers<[2], [2], [1], [1], [0, 0, 0, 1, 1, 1], [0], [0]>} : vector<1x8x8xbf16>, vector<1x8x8xbf16>, vector<1x8x8xf32> -> vector<1x8x8xf32>
    "tpu.trace_stop"() : () -> ()
    %cst_21 = arith.constant dense<0xFF800000> : vector<1x8xf32>
    %45 = vector.multi_reduction <maximumf>, %44, %cst_21 [2] : vector<1x8x8xf32> to vector<1x8xf32>
    %46 = vector.shape_cast %45 : vector<1x8xf32> to vector<1x8x1xf32>
    %47 = vector.broadcast %46 : vector<1x8x1xf32> to vector<1x8x8xf32>
    %48 = arith.subf %44, %47 : vector<1x8x8xf32>
    %49 = math.exp %48 : vector<1x8x8xf32>
    %cst_22 = arith.constant dense<0.000000e+00> : vector<1x8xf32>
    %50 = vector.multi_reduction <add>, %49, %cst_22 [2] : vector<1x8x8xf32> to vector<1x8xf32>
    %51 = vector.shape_cast %50 : vector<1x8xf32> to vector<1x8x1xf32>
    %52 = tpu.reciprocal %51 {approx = true} : vector<1x8x1xf32> -> vector<1x8x1xf32>
    %53 = vector.broadcast %52 : vector<1x8x1xf32> to vector<1x8x8xf32>
    %54 = arith.mulf %49, %53 : vector<1x8x8xf32>
    %55 = arith.truncf %54 : vector<1x8x8xf32> to vector<1x8x8xbf16>
    "tpu.trace_start"() <{level = 10 : i32, message = "bqk,bkh->bqh"}> : () -> ()
    %cst_23 = arith.constant dense<0.000000e+00> : vector<1x8x8xf32>
    %56 = tpu.matmul %55, %43, %cst_23 {dimension_numbers = #tpu.dot_dimension_numbers<[2], [1], [1], [2], [0, 0, 0, 1, 1, 2], [0], [0]>} : vector<1x8x8xbf16>, vector<1x8x8xbf16>, vector<1x8x8xf32> -> vector<1x8x8xf32>
    "tpu.trace_stop"() : () -> ()
    %57 = vector.shape_cast %56 : vector<1x8x8xf32> to vector<8x8xf32>
    %58 = arith.truncf %57 : vector<8x8xf32> to vector<8x8xbf16>
    %59 = vector.extract_strided_slice %33 {offsets = [0, 0], sizes = [8, 32], strides = [1, 1]} : vector<32x32xbf16> to vector<8x32xbf16>
    %cst_24 = arith.constant dense<0.000000e+00> : vector<8x32xf32>
    %60 = tpu.matmul %58, %59, %cst_24 {dimension_numbers = #tpu.dot_dimension_numbers<[1], [0], [0], [1], [0, 0, 1, 1], [], []>} : vector<8x8xbf16>, vector<8x32xbf16>, vector<8x32xf32> -> vector<8x32xf32>
    %61 = arith.addf %34, %60 : vector<8x32xf32>
    %62 = vector.extract_strided_slice %31 {offsets = [0, 8], sizes = [8, 8], strides = [1, 1]} : vector<8x96xf32> to vector<8x8xf32>
    %63 = arith.truncf %62 : vector<8x8xf32> to vector<8x8xbf16>
    %64 = vector.shape_cast %63 : vector<8x8xbf16> to vector<1x8x8xbf16>
    %65 = vector.extract_strided_slice %31 {offsets = [0, 40], sizes = [8, 8], strides = [1, 1]} : vector<8x96xf32> to vector<8x8xf32>
    %66 = arith.truncf %65 : vector<8x8xf32> to vector<8x8xbf16>
    %67 = vector.shape_cast %66 : vector<8x8xbf16> to vector<1x8x8xbf16>
    %68 = vector.extract_strided_slice %31 {offsets = [0, 72], sizes = [8, 8], strides = [1, 1]} : vector<8x96xf32> to vector<8x8xf32>
    %69 = arith.truncf %68 : vector<8x8xf32> to vector<8x8xbf16>
    %70 = vector.shape_cast %69 : vector<8x8xbf16> to vector<1x8x8xbf16>
    "tpu.trace_start"() <{level = 10 : i32, message = "bqh,bkh->bqk"}> : () -> ()
    %cst_25 = arith.constant dense<0.000000e+00> : vector<1x8x8xf32>
    %71 = tpu.matmul %64, %67, %cst_25 {dimension_numbers = #tpu.dot_dimension_numbers<[2], [2], [1], [1], [0, 0, 0, 1, 1, 1], [0], [0]>} : vector<1x8x8xbf16>, vector<1x8x8xbf16>, vector<1x8x8xf32> -> vector<1x8x8xf32>
    "tpu.trace_stop"() : () -> ()
    %cst_26 = arith.constant dense<0xFF800000> : vector<1x8xf32>
    %72 = vector.multi_reduction <maximumf>, %71, %cst_26 [2] : vector<1x8x8xf32> to vector<1x8xf32>
    %73 = vector.shape_cast %72 : vector<1x8xf32> to vector<1x8x1xf32>
    %74 = vector.broadcast %73 : vector<1x8x1xf32> to vector<1x8x8xf32>
    %75 = arith.subf %71, %74 : vector<1x8x8xf32>
    %76 = math.exp %75 : vector<1x8x8xf32>
    %cst_27 = arith.constant dense<0.000000e+00> : vector<1x8xf32>
    %77 = vector.multi_reduction <add>, %76, %cst_27 [2] : vector<1x8x8xf32> to vector<1x8xf32>
    %78 = vector.shape_cast %77 : vector<1x8xf32> to vector<1x8x1xf32>
    %79 = tpu.reciprocal %78 {approx = true} : vector<1x8x1xf32> -> vector<1x8x1xf32>
    %80 = vector.broadcast %79 : vector<1x8x1xf32> to vector<1x8x8xf32>
    %81 = arith.mulf %76, %80 : vector<1x8x8xf32>
    %82 = arith.truncf %81 : vector<1x8x8xf32> to vector<1x8x8xbf16>
    "tpu.trace_start"() <{level = 10 : i32, message = "bqk,bkh->bqh"}> : () -> ()
    %cst_28 = arith.constant dense<0.000000e+00> : vector<1x8x8xf32>
    %83 = tpu.matmul %82, %70, %cst_28 {dimension_numbers = #tpu.dot_dimension_numbers<[2], [1], [1], [2], [0, 0, 0, 1, 1, 2], [0], [0]>} : vector<1x8x8xbf16>, vector<1x8x8xbf16>, vector<1x8x8xf32> -> vector<1x8x8xf32>
    "tpu.trace_stop"() : () -> ()
    %84 = vector.shape_cast %83 : vector<1x8x8xf32> to vector<8x8xf32>
    %85 = arith.truncf %84 : vector<8x8xf32> to vector<8x8xbf16>
    %86 = vector.extract_strided_slice %33 {offsets = [8, 0], sizes = [8, 32], strides = [1, 1]} : vector<32x32xbf16> to vector<8x32xbf16>
    %cst_29 = arith.constant dense<0.000000e+00> : vector<8x32xf32>
    %87 = tpu.matmul %85, %86, %cst_29 {dimension_numbers = #tpu.dot_dimension_numbers<[1], [0], [0], [1], [0, 0, 1, 1], [], []>} : vector<8x8xbf16>, vector<8x32xbf16>, vector<8x32xf32> -> vector<8x32xf32>
    %88 = arith.addf %61, %87 : vector<8x32xf32>
    %89 = vector.extract_strided_slice %31 {offsets = [0, 16], sizes = [8, 8], strides = [1, 1]} : vector<8x96xf32> to vector<8x8xf32>
    %90 = arith.truncf %89 : vector<8x8xf32> to vector<8x8xbf16>
    %91 = vector.shape_cast %90 : vector<8x8xbf16> to vector<1x8x8xbf16>
    %92 = vector.extract_strided_slice %31 {offsets = [0, 48], sizes = [8, 8], strides = [1, 1]} : vector<8x96xf32> to vector<8x8xf32>
    %93 = arith.truncf %92 : vector<8x8xf32> to vector<8x8xbf16>
    %94 = vector.shape_cast %93 : vector<8x8xbf16> to vector<1x8x8xbf16>
    %95 = vector.extract_strided_slice %31 {offsets = [0, 80], sizes = [8, 8], strides = [1, 1]} : vector<8x96xf32> to vector<8x8xf32>
    %96 = arith.truncf %95 : vector<8x8xf32> to vector<8x8xbf16>
    %97 = vector.shape_cast %96 : vector<8x8xbf16> to vector<1x8x8xbf16>
    "tpu.trace_start"() <{level = 10 : i32, message = "bqh,bkh->bqk"}> : () -> ()
    %cst_30 = arith.constant dense<0.000000e+00> : vector<1x8x8xf32>
    %98 = tpu.matmul %91, %94, %cst_30 {dimension_numbers = #tpu.dot_dimension_numbers<[2], [2], [1], [1], [0, 0, 0, 1, 1, 1], [0], [0]>} : vector<1x8x8xbf16>, vector<1x8x8xbf16>, vector<1x8x8xf32> -> vector<1x8x8xf32>
    "tpu.trace_stop"() : () -> ()
    %cst_31 = arith.constant dense<0xFF800000> : vector<1x8xf32>
    %99 = vector.multi_reduction <maximumf>, %98, %cst_31 [2] : vector<1x8x8xf32> to vector<1x8xf32>
    %100 = vector.shape_cast %99 : vector<1x8xf32> to vector<1x8x1xf32>
    %101 = vector.broadcast %100 : vector<1x8x1xf32> to vector<1x8x8xf32>
    %102 = arith.subf %98, %101 : vector<1x8x8xf32>
    %103 = math.exp %102 : vector<1x8x8xf32>
    %cst_32 = arith.constant dense<0.000000e+00> : vector<1x8xf32>
    %104 = vector.multi_reduction <add>, %103, %cst_32 [2] : vector<1x8x8xf32> to vector<1x8xf32>
    %105 = vector.shape_cast %104 : vector<1x8xf32> to vector<1x8x1xf32>
    %106 = tpu.reciprocal %105 {approx = true} : vector<1x8x1xf32> -> vector<1x8x1xf32>
    %107 = vector.broadcast %106 : vector<1x8x1xf32> to vector<1x8x8xf32>
    %108 = arith.mulf %103, %107 : vector<1x8x8xf32>
    %109 = arith.truncf %108 : vector<1x8x8xf32> to vector<1x8x8xbf16>
    "tpu.trace_start"() <{level = 10 : i32, message = "bqk,bkh->bqh"}> : () -> ()
    %cst_33 = arith.constant dense<0.000000e+00> : vector<1x8x8xf32>
    %110 = tpu.matmul %109, %97, %cst_33 {dimension_numbers = #tpu.dot_dimension_numbers<[2], [1], [1], [2], [0, 0, 0, 1, 1, 2], [0], [0]>} : vector<1x8x8xbf16>, vector<1x8x8xbf16>, vector<1x8x8xf32> -> vector<1x8x8xf32>
    "tpu.trace_stop"() : () -> ()
    %111 = vector.shape_cast %110 : vector<1x8x8xf32> to vector<8x8xf32>
    %112 = arith.truncf %111 : vector<8x8xf32> to vector<8x8xbf16>
    %113 = vector.extract_strided_slice %33 {offsets = [16, 0], sizes = [8, 32], strides = [1, 1]} : vector<32x32xbf16> to vector<8x32xbf16>
    %cst_34 = arith.constant dense<0.000000e+00> : vector<8x32xf32>
    %114 = tpu.matmul %112, %113, %cst_34 {dimension_numbers = #tpu.dot_dimension_numbers<[1], [0], [0], [1], [0, 0, 1, 1], [], []>} : vector<8x8xbf16>, vector<8x32xbf16>, vector<8x32xf32> -> vector<8x32xf32>
    %115 = arith.addf %88, %114 : vector<8x32xf32>
    %116 = vector.extract_strided_slice %31 {offsets = [0, 24], sizes = [8, 8], strides = [1, 1]} : vector<8x96xf32> to vector<8x8xf32>
    %117 = arith.truncf %116 : vector<8x8xf32> to vector<8x8xbf16>
    %118 = vector.shape_cast %117 : vector<8x8xbf16> to vector<1x8x8xbf16>
    %119 = vector.extract_strided_slice %31 {offsets = [0, 56], sizes = [8, 8], strides = [1, 1]} : vector<8x96xf32> to vector<8x8xf32>
    %120 = arith.truncf %119 : vector<8x8xf32> to vector<8x8xbf16>
    %121 = vector.shape_cast %120 : vector<8x8xbf16> to vector<1x8x8xbf16>
    %122 = vector.extract_strided_slice %31 {offsets = [0, 88], sizes = [8, 8], strides = [1, 1]} : vector<8x96xf32> to vector<8x8xf32>
    %123 = arith.truncf %122 : vector<8x8xf32> to vector<8x8xbf16>
    %124 = vector.shape_cast %123 : vector<8x8xbf16> to vector<1x8x8xbf16>
    "tpu.trace_start"() <{level = 10 : i32, message = "bqh,bkh->bqk"}> : () -> ()
    %cst_35 = arith.constant dense<0.000000e+00> : vector<1x8x8xf32>
    %125 = tpu.matmul %118, %121, %cst_35 {dimension_numbers = #tpu.dot_dimension_numbers<[2], [2], [1], [1], [0, 0, 0, 1, 1, 1], [0], [0]>} : vector<1x8x8xbf16>, vector<1x8x8xbf16>, vector<1x8x8xf32> -> vector<1x8x8xf32>
    "tpu.trace_stop"() : () -> ()
    %cst_36 = arith.constant dense<0xFF800000> : vector<1x8xf32>
    %126 = vector.multi_reduction <maximumf>, %125, %cst_36 [2] : vector<1x8x8xf32> to vector<1x8xf32>
    %127 = vector.shape_cast %126 : vector<1x8xf32> to vector<1x8x1xf32>
    %128 = vector.broadcast %127 : vector<1x8x1xf32> to vector<1x8x8xf32>
    %129 = arith.subf %125, %128 : vector<1x8x8xf32>
    %130 = math.exp %129 : vector<1x8x8xf32>
    %cst_37 = arith.constant dense<0.000000e+00> : vector<1x8xf32>
    %131 = vector.multi_reduction <add>, %130, %cst_37 [2] : vector<1x8x8xf32> to vector<1x8xf32>
    %132 = vector.shape_cast %131 : vector<1x8xf32> to vector<1x8x1xf32>
    %133 = tpu.reciprocal %132 {approx = true} : vector<1x8x1xf32> -> vector<1x8x1xf32>
    %134 = vector.broadcast %133 : vector<1x8x1xf32> to vector<1x8x8xf32>
    %135 = arith.mulf %130, %134 : vector<1x8x8xf32>
    %136 = arith.truncf %135 : vector<1x8x8xf32> to vector<1x8x8xbf16>
    "tpu.trace_start"() <{level = 10 : i32, message = "bqk,bkh->bqh"}> : () -> ()
    %cst_38 = arith.constant dense<0.000000e+00> : vector<1x8x8xf32>
    %137 = tpu.matmul %136, %124, %cst_38 {dimension_numbers = #tpu.dot_dimension_numbers<[2], [1], [1], [2], [0, 0, 0, 1, 1, 2], [0], [0]>} : vector<1x8x8xbf16>, vector<1x8x8xbf16>, vector<1x8x8xf32> -> vector<1x8x8xf32>
    "tpu.trace_stop"() : () -> ()
    %138 = vector.shape_cast %137 : vector<1x8x8xf32> to vector<8x8xf32>
    %139 = arith.truncf %138 : vector<8x8xf32> to vector<8x8xbf16>
    %140 = vector.extract_strided_slice %33 {offsets = [24, 0], sizes = [8, 32], strides = [1, 1]} : vector<32x32xbf16> to vector<8x32xbf16>
    %cst_39 = arith.constant dense<0.000000e+00> : vector<8x32xf32>
    %141 = tpu.matmul %139, %140, %cst_39 {dimension_numbers = #tpu.dot_dimension_numbers<[1], [0], [0], [1], [0, 0, 1, 1], [], []>} : vector<8x8xbf16>, vector<8x32xbf16>, vector<8x32xf32> -> vector<8x32xf32>
    %142 = arith.addf %115, %141 : vector<8x32xf32>
    %c0_40 = arith.constant 0 : index
    %c0_41 = arith.constant 0 : index
    %c0_42 = arith.constant 0 : index
    %143 = vector.load %arg10[%c0_40, %c0_41, %c0_42] : memref<1x1x32xf32, #tpu.memory_space<vmem>>, vector<1x1x32xf32>
    %144 = vector.shape_cast %143 : vector<1x1x32xf32> to vector<1x32xf32>
    %c0_43 = arith.constant 0 : index
    %c0_44 = arith.constant 0 : index
    %c0_45 = arith.constant 0 : index
    %145 = vector.load %arg11[%c0_43, %c0_44, %c0_45] : memref<1x1x32xf32, #tpu.memory_space<vmem>>, vector<1x1x32xf32>
    %146 = vector.shape_cast %145 : vector<1x1x32xf32> to vector<1x32xf32>
    %cst_46 = arith.constant dense<0.000000e+00> : vector<8xf32>
    %147 = vector.multi_reduction <add>, %142, %cst_46 [1] : vector<8x32xf32> to vector<8xf32>
    %148 = vector.shape_cast %147 : vector<8xf32> to vector<8x1xf32>
    %cst_47 = arith.constant 3.200000e+01 : f32
    %149 = vector.broadcast %cst_47 : f32 to vector<8x1xf32>
    %150 = arith.divf %148, %149 : vector<8x1xf32>
    %151 = vector.broadcast %150 : vector<8x1xf32> to vector<8x32xf32>
    %152 = arith.subf %142, %151 : vector<8x32xf32>
    %153 = arith.mulf %152, %152 : vector<8x32xf32>
    %cst_48 = arith.constant dense<0.000000e+00> : vector<8xf32>
    %154 = vector.multi_reduction <add>, %153, %cst_48 [1] : vector<8x32xf32> to vector<8xf32>
    %155 = vector.shape_cast %154 : vector<8xf32> to vector<8x1xf32>
    %cst_49 = arith.constant 3.200000e+01 : f32
    %156 = vector.broadcast %cst_49 : f32 to vector<8x1xf32>
    %157 = arith.divf %155, %156 : vector<8x1xf32>
    %cst_50 = arith.constant 9.99999974E-6 : f32
    %158 = vector.broadcast %cst_50 : f32 to vector<8x1xf32>
    %159 = arith.addf %157, %158 : vector<8x1xf32>
    %160 = math.rsqrt %159 : vector<8x1xf32>
    %161 = vector.broadcast %160 : vector<8x1xf32> to vector<8x32xf32>
    %162 = arith.mulf %152, %161 : vector<8x32xf32>
    %163 = vector.broadcast %144 : vector<1x32xf32> to vector<8x32xf32>
    %164 = arith.mulf %162, %163 : vector<8x32xf32>
    %165 = vector.broadcast %146 : vector<1x32xf32> to vector<8x32xf32>
    %166 = arith.addf %164, %165 : vector<8x32xf32>
    %167 = arith.addf %3, %166 : vector<8x32xf32>
    %c0_51 = arith.constant 0 : index
    %c0_52 = arith.constant 0 : index
    %c0_53 = arith.constant 0 : index
    %168 = vector.load %arg12[%c0_51, %c0_52, %c0_53] : memref<1x1x32xf32, #tpu.memory_space<vmem>>, vector<1x1x32xf32>
    %169 = vector.shape_cast %168 : vector<1x1x32xf32> to vector<1x32xf32>
    %c0_54 = arith.constant 0 : index
    %c0_55 = arith.constant 0 : index
    %c0_56 = arith.constant 0 : index
    %170 = vector.load %arg13[%c0_54, %c0_55, %c0_56] : memref<1x1x32xf32, #tpu.memory_space<vmem>>, vector<1x1x32xf32>
    %171 = vector.shape_cast %170 : vector<1x1x32xf32> to vector<1x32xf32>
    %cst_57 = arith.constant dense<0.000000e+00> : vector<8xf32>
    %172 = vector.multi_reduction <add>, %167, %cst_57 [1] : vector<8x32xf32> to vector<8xf32>
    %173 = vector.shape_cast %172 : vector<8xf32> to vector<8x1xf32>
    %cst_58 = arith.constant 3.200000e+01 : f32
    %174 = vector.broadcast %cst_58 : f32 to vector<8x1xf32>
    %175 = arith.divf %173, %174 : vector<8x1xf32>
    %176 = vector.broadcast %175 : vector<8x1xf32> to vector<8x32xf32>
    %177 = arith.subf %167, %176 : vector<8x32xf32>
    %178 = arith.mulf %177, %177 : vector<8x32xf32>
    %cst_59 = arith.constant dense<0.000000e+00> : vector<8xf32>
    %179 = vector.multi_reduction <add>, %178, %cst_59 [1] : vector<8x32xf32> to vector<8xf32>
    %180 = vector.shape_cast %179 : vector<8xf32> to vector<8x1xf32>
    %cst_60 = arith.constant 3.200000e+01 : f32
    %181 = vector.broadcast %cst_60 : f32 to vector<8x1xf32>
    %182 = arith.divf %180, %181 : vector<8x1xf32>
    %cst_61 = arith.constant 9.99999974E-6 : f32
    %183 = vector.broadcast %cst_61 : f32 to vector<8x1xf32>
    %184 = arith.addf %182, %183 : vector<8x1xf32>
    %185 = math.rsqrt %184 : vector<8x1xf32>
    %186 = vector.broadcast %185 : vector<8x1xf32> to vector<8x32xf32>
    %187 = arith.mulf %177, %186 : vector<8x32xf32>
    %188 = vector.broadcast %169 : vector<1x32xf32> to vector<8x32xf32>
    %189 = arith.mulf %187, %188 : vector<8x32xf32>
    %190 = vector.broadcast %171 : vector<1x32xf32> to vector<8x32xf32>
    %191 = arith.addf %189, %190 : vector<8x32xf32>
    %192 = arith.truncf %191 : vector<8x32xf32> to vector<8x32xbf16>
    %c0_62 = arith.constant 0 : index
    %c0_63 = arith.constant 0 : index
    %c0_64 = arith.constant 0 : index
    %193 = vector.load %arg14[%c0_62, %c0_63, %c0_64] : memref<1x32x256xbf16, #tpu.memory_space<vmem>>, vector<1x32x256xbf16>
    %194 = vector.shape_cast %193 : vector<1x32x256xbf16> to vector<32x256xbf16>
    %cst_65 = arith.constant dense<0.000000e+00> : vector<8x256xf32>
    %195 = tpu.matmul %192, %194, %cst_65 {dimension_numbers = #tpu.dot_dimension_numbers<[1], [0], [0], [1], [0, 0, 1, 1], [], []>} : vector<8x32xbf16>, vector<32x256xbf16>, vector<8x256xf32> -> vector<8x256xf32>
    %196 = vector.extract_strided_slice %195 {offsets = [0, 0], sizes = [8, 128], strides = [1, 1]} : vector<8x256xf32> to vector<8x128xf32>
    %197 = vector.extract_strided_slice %195 {offsets = [0, 128], sizes = [8, 128], strides = [1, 1]} : vector<8x256xf32> to vector<8x128xf32>
    %198 = arith.negf %197 : vector<8x128xf32>
    %199 = math.exp %198 : vector<8x128xf32>
    %cst_66 = arith.constant 1.000000e+00 : f32
    %200 = vector.broadcast %cst_66 : f32 to vector<8x128xf32>
    %201 = arith.addf %200, %199 : vector<8x128xf32>
    %202 = arith.divf %200, %201 : vector<8x128xf32>
    %203 = arith.mulf %197, %202 : vector<8x128xf32>
    %204 = arith.mulf %203, %196 : vector<8x128xf32>
    %c0_67 = arith.constant 0 : index
    %c0_68 = arith.constant 0 : index
    %c0_69 = arith.constant 0 : index
    %205 = vector.load %arg15[%c0_67, %c0_68, %c0_69] : memref<1x1x128xf32, #tpu.memory_space<vmem>>, vector<1x1x128xf32>
    %206 = vector.shape_cast %205 : vector<1x1x128xf32> to vector<1x128xf32>
    %c0_70 = arith.constant 0 : index
    %c0_71 = arith.constant 0 : index
    %c0_72 = arith.constant 0 : index
    %207 = vector.load %arg16[%c0_70, %c0_71, %c0_72] : memref<1x1x128xf32, #tpu.memory_space<vmem>>, vector<1x1x128xf32>
    %208 = vector.shape_cast %207 : vector<1x1x128xf32> to vector<1x128xf32>
    %cst_73 = arith.constant dense<0.000000e+00> : vector<8xf32>
    %209 = vector.multi_reduction <add>, %204, %cst_73 [1] : vector<8x128xf32> to vector<8xf32>
    %210 = vector.shape_cast %209 : vector<8xf32> to vector<8x1xf32>
    %cst_74 = arith.constant 1.280000e+02 : f32
    %211 = vector.broadcast %cst_74 : f32 to vector<8x1xf32>
    %212 = arith.divf %210, %211 : vector<8x1xf32>
    %213 = vector.broadcast %212 : vector<8x1xf32> to vector<8x128xf32>
    %214 = arith.subf %204, %213 : vector<8x128xf32>
    %215 = arith.mulf %214, %214 : vector<8x128xf32>
    %cst_75 = arith.constant dense<0.000000e+00> : vector<8xf32>
    %216 = vector.multi_reduction <add>, %215, %cst_75 [1] : vector<8x128xf32> to vector<8xf32>
    %217 = vector.shape_cast %216 : vector<8xf32> to vector<8x1xf32>
    %cst_76 = arith.constant 1.280000e+02 : f32
    %218 = vector.broadcast %cst_76 : f32 to vector<8x1xf32>
    %219 = arith.divf %217, %218 : vector<8x1xf32>
    %cst_77 = arith.constant 9.99999974E-6 : f32
    %220 = vector.broadcast %cst_77 : f32 to vector<8x1xf32>
    %221 = arith.addf %219, %220 : vector<8x1xf32>
    %222 = math.rsqrt %221 : vector<8x1xf32>
    %223 = vector.broadcast %222 : vector<8x1xf32> to vector<8x128xf32>
    %224 = arith.mulf %214, %223 : vector<8x128xf32>
    %225 = vector.broadcast %206 : vector<1x128xf32> to vector<8x128xf32>
    %226 = arith.mulf %224, %225 : vector<8x128xf32>
    %227 = vector.broadcast %208 : vector<1x128xf32> to vector<8x128xf32>
    %228 = arith.addf %226, %227 : vector<8x128xf32>
    %229 = arith.truncf %228 : vector<8x128xf32> to vector<8x128xbf16>
    %c0_78 = arith.constant 0 : index
    %c0_79 = arith.constant 0 : index
    %c0_80 = arith.constant 0 : index
    %230 = vector.load %arg17[%c0_78, %c0_79, %c0_80] : memref<1x128x32xbf16, #tpu.memory_space<vmem>>, vector<1x128x32xbf16>
    %231 = vector.shape_cast %230 : vector<1x128x32xbf16> to vector<128x32xbf16>
    %cst_81 = arith.constant dense<0.000000e+00> : vector<8x32xf32>
    %232 = tpu.matmul %229, %231, %cst_81 {dimension_numbers = #tpu.dot_dimension_numbers<[1], [0], [0], [1], [0, 0, 1, 1], [], []>} : vector<8x128xbf16>, vector<128x32xbf16>, vector<8x32xf32> -> vector<8x32xf32>
    %233 = arith.addf %167, %232 : vector<8x32xf32>
    %c0_82 = arith.constant 0 : index
    %c0_83 = arith.constant 0 : index
    %234 = vector.load %arg19[%c0_82, %c0_83] : memref<8x32xf32, #tpu.memory_space<vmem>>, vector<8x32xf32>
    tpu.vector_store %arg19[%c0_82, %c0_83], %233 {strides = array<i32>} : memref<8x32xf32, #tpu.memory_space<vmem>>, vector<8x32xf32>,
    %c1_i32 = arith.constant 1 : i32
    %235 = arith.cmpi eq, %arg1, %c1_i32 : i32
    %236 = arith.extui %235 : i1 to i32
    %c0_i32_84 = arith.constant 0 : i32
    %237 = arith.cmpi ne, %236, %c0_i32_84 : i32
    scf.if %237 {
      %238 = vector.shape_cast %233 : vector<8x32xf32> to vector<1x8x32xf32>
      %c0_85 = arith.constant 0 : index
      %c0_86 = arith.constant 0 : index
      %c0_87 = arith.constant 0 : index
      %239 = vector.load %arg18[%c0_85, %c0_86, %c0_87] : memref<1x8x32xf32, #tpu.memory_space<vmem>>, vector<1x8x32xf32>
      tpu.vector_store %arg18[%c0_85, %c0_86, %c0_87], %238 {strides = array<i32>} : memref<1x8x32xf32, #tpu.memory_space<vmem>>, vector<1x8x32xf32>,
    } else {
    }
    return
  }
  func.func @transform_0(%arg0: i32, %arg1: i32) -> (i32, i32, i32) {
    %c0_i32 = arith.constant 0 : i32
    %c0_i32_0 = arith.constant 0 : i32
    %c0_i32_1 = arith.constant 0 : i32
    return %arg0, %c0_i32, %c0_i32_0 : i32, i32, i32
  }
  func.func @transform_1(%arg0: i32, %arg1: i32) -> (i32, i32, i32) {
    %c0_i32 = arith.constant 0 : i32
    %c0_i32_0 = arith.constant 0 : i32
    %c0_i32_1 = arith.constant 0 : i32
    %c0_i32_2 = arith.constant 0 : i32
    return %c0_i32, %c0_i32_0, %c0_i32_1 : i32, i32, i32
  }
  func.func @transform_2(%arg0: i32, %arg1: i32) -> (i32, i32) {
    %c0_i32 = arith.constant 0 : i32
    %c0_i32_0 = arith.constant 0 : i32
    %c0_i32_1 = arith.constant 0 : i32
    return %c0_i32, %c0_i32_0 : i32, i32
  }
  func.func @transform_3(%arg0: i32, %arg1: i32) -> (i32, i32) {
    %c0_i32 = arith.constant 0 : i32
    %c0_i32_0 = arith.constant 0 : i32
    %c0_i32_1 = arith.constant 0 : i32
    return %c0_i32, %c0_i32_0 : i32, i32
  }
  func.func @transform_4(%arg0: i32, %arg1: i32) -> (i32, i32, i32) {
    %c0_i32 = arith.constant 0 : i32
    %c0_i32_0 = arith.constant 0 : i32
    %c0_i32_1 = arith.constant 0 : i32
    return %arg1, %c0_i32, %c0_i32_0 : i32, i32, i32
  }
  func.func @transform_5(%arg0: i32, %arg1: i32) -> (i32, i32, i32) {
    %c0_i32 = arith.constant 0 : i32
    %c0_i32_0 = arith.constant 0 : i32
    %c0_i32_1 = arith.constant 0 : i32
    return %arg1, %c0_i32, %c0_i32_0 : i32, i32, i32
  }
  func.func @transform_6(%arg0: i32, %arg1: i32) -> (i32, i32, i32) {
    %c0_i32 = arith.constant 0 : i32
    %c0_i32_0 = arith.constant 0 : i32
    %c0_i32_1 = arith.constant 0 : i32
    return %arg1, %c0_i32, %c0_i32_0 : i32, i32, i32
  }
  func.func @transform_7(%arg0: i32, %arg1: i32) -> (i32, i32, i32) {
    %c0_i32 = arith.constant 0 : i32
    %c0_i32_0 = arith.constant 0 : i32
    %c0_i32_1 = arith.constant 0 : i32
    return %arg1, %c0_i32, %c0_i32_0 : i32, i32, i32
  }
  func.func @transform_8(%arg0: i32, %arg1: i32) -> (i32, i32, i32) {
    %c0_i32 = arith.constant 0 : i32
    %c0_i32_0 = arith.constant 0 : i32
    %c0_i32_1 = arith.constant 0 : i32
    return %arg1, %c0_i32, %c0_i32_0 : i32, i32, i32
  }
  func.func @transform_9(%arg0: i32, %arg1: i32) -> (i32, i32, i32) {
    %c0_i32 = arith.constant 0 : i32
    %c0_i32_0 = arith.constant 0 : i32
    %c0_i32_1 = arith.constant 0 : i32
    return %arg1, %c0_i32, %c0_i32_0 : i32, i32, i32
  }
  func.func @transform_10(%arg0: i32, %arg1: i32) -> (i32, i32, i32) {
    %c0_i32 = arith.constant 0 : i32
    %c0_i32_0 = arith.constant 0 : i32
    %c0_i32_1 = arith.constant 0 : i32
    return %arg1, %c0_i32, %c0_i32_0 : i32, i32, i32
  }
  func.func @transform_11(%arg0: i32, %arg1: i32) -> (i32, i32, i32) {
    %c0_i32 = arith.constant 0 : i32
    %c0_i32_0 = arith.constant 0 : i32
    %c0_i32_1 = arith.constant 0 : i32
    return %arg1, %c0_i32, %c0_i32_0 : i32, i32, i32
  }
  func.func @transform_12(%arg0: i32, %arg1: i32) -> (i32, i32, i32) {
    %c0_i32 = arith.constant 0 : i32
    %c0_i32_0 = arith.constant 0 : i32
    %c0_i32_1 = arith.constant 0 : i32
    return %arg1, %c0_i32, %c0_i32_0 : i32, i32, i32
  }
  func.func @transform_13(%arg0: i32, %arg1: i32) -> (i32, i32, i32) {
    %c0_i32 = arith.constant 0 : i32
    %c0_i32_0 = arith.constant 0 : i32
    %c0_i32_1 = arith.constant 0 : i32
    return %arg1, %c0_i32, %c0_i32_0 : i32, i32, i32
  }
  func.func @transform_14(%arg0: i32, %arg1: i32) -> (i32, i32, i32) {
    %c0_i32 = arith.constant 0 : i32
    %c0_i32_0 = arith.constant 0 : i32
    %c0_i32_1 = arith.constant 0 : i32
    return %arg1, %c0_i32, %c0_i32_0 : i32, i32, i32
  }
  func.func @transform_15(%arg0: i32, %arg1: i32) -> (i32, i32, i32) {
    %c0_i32 = arith.constant 0 : i32
    %c0_i32_0 = arith.constant 0 : i32
    %c0_i32_1 = arith.constant 0 : i32
    return %arg1, %c0_i32, %c0_i32_0 : i32, i32, i32
  }
  func.func @transform_16(%arg0: i32, %arg1: i32) -> (i32, i32, i32) {
    %c0_i32 = arith.constant 0 : i32
    %c0_i32_0 = arith.constant 0 : i32
    %c0_i32_1 = arith.constant 0 : i32
    return %arg0, %c0_i32, %c0_i32_0 : i32, i32, i32
  }
}

</mosaic_0001>

<bundles_post_ra>
// kernel: tpu_custom_call.1
= control target key start
LH: loop header
LB: loop body
LE: loop exit
PB: predicated region body
PF: predicated region fallthrough
CT: control target
= control target key end

     0   :  { %s4484_s0 = inlined_call_operand.hbm [shape: f32[2,8,32], index: 0, kind: input, shape index: {}]   ;;  %s4485_s1 = inlined_call_operand.hbm [shape: f32[1,8,32], index: 1, kind: input, shape index: {}]   ;;  %s4486_s2 = inlined_call_operand.hbm [shape: f32[1,32], index: 2, kind: input, shape index: {}]   ;;  %s4487_s3 = inlined_call_operand.hbm [shape: f32[1,32], index: 3, kind: input, shape index: {}]   ;;  %s4488_s4 = inlined_call_operand.hbm [shape: f32[2,1,32], index: 4, kind: input, shape index: {}]   ;;  %s4489_s5 = inlined_call_operand.hbm [shape: f32[2,1,32], index: 5, kind: input, shape index: {}]   ;;  %s4490_s6 = inlined_call_operand.hbm [shape: bf16[2,32,96], index: 6, kind: input, shape index: {}]   ;;  %s4491_s7 = inlined_call_operand.hbm [shape: bf16[2,32,32], index: 7, kind: input, shape index: {}]   ;;  %s4492_s8 = inlined_call_operand.hbm [shape: f32[2,1,32], index: 8, kind: input, shape index: {}]   ;;  %s4493_s9 = inlined_call_operand.hbm [shape: f32[2,1,32], index: 9, kind: input, shape index: {}]   ;;  %s4494_s10 = inlined_call_operand.hbm [shape: f32[2,1,32], index: 10, kind: input, shape index: {}]   ;;  %s4495_s11 = inlined_call_operand.hbm [shape: f32[2,1,32], index: 11, kind: input, shape index: {}]   ;;  %s4496_s12 = inlined_call_operand.hbm [shape: bf16[2,32,256], index: 12, kind: input, shape index: {}]   ;;  %s4497_s13 = inlined_call_operand.hbm [shape: f32[2,1,128], index: 13, kind: input, shape index: {}]   ;;  %s4498_s14 = inlined_call_operand.hbm [shape: f32[2,1,128], index: 14, kind: input, shape index: {}]   ;;  %s4499_s15 = inlined_call_operand.hbm [shape: bf16[2,128,32], index: 15, kind: input, shape index: {}]   ;;  %s4500_s16 = inlined_call_operand.hbm [shape: f32[2,8,32], index: 16, kind: output, shape index: {}]  }
   0x1   :  { %4535 = sst [smem:[#allocation42_spill]] %s4484_s0 }
   0x2   :  { %4536 = sst [smem:[#allocation43_spill]] %s4485_s1 }
   0x3   :  { %4537 = sst [smem:[#allocation44_spill]] %s4486_s2 }
   0x4   :  { %4538 = sst [smem:[#allocation45_spill]] %s4487_s3 }
   0x5   :  { %4539 = sst [smem:[#allocation46_spill]] %s4488_s4 }
   0x6   :  { %4540 = sst [smem:[#allocation47_spill]] %s4489_s5 }
   0x7   :  { %4541 = sst [smem:[#allocation48_spill]] %s4490_s6 }
   0x8   :  { %4542 = sst [smem:[#allocation49_spill]] %s4491_s7 }
   0x9   :  { %4543 = sst [smem:[#allocation50_spill]] %s4492_s8 }
   0xa   :  { %4544 = sst [smem:[#allocation51_spill]] %s4493_s9 }
   0xb   :  { %4545 = sst [smem:[#allocation52_spill]] %s4494_s10 }
   0xc   :  { %4546 = sst [smem:[#allocation53_spill]] %s4495_s11 }
   0xd   :  { %4547 = sst [smem:[#allocation54_spill]] %s4496_s12 }
   0xe   :  { %4548 = sst [smem:[#allocation55_spill]] %s4498_s14 }
   0xf   :  { %4549 = sst [smem:[#allocation56_spill]] %s4499_s15 }
  0x10   :  { %4550 = sst [smem:[#allocation57_spill]] %s4500_s16 }
  0x11   :  { %21 = vsyncpa [#allocation4], 0 }
  0x12   :  { %23 = vsyncpa [#allocation4 + $0x1], 0 }
  0x13   :  { %24 = vsyncpa [#allocation7], 0 }
  0x14   :  { %25 = vsyncpa [#allocation10], 0 }
  0x15   :  { %26 = vsyncpa [#allocation5], 0 }
  0x16   :  { %28 = vsyncpa [#allocation5 + $0x1], 0  ;;  %s3590_s21 = smov 0   ;;  %s3592_s22 = smov 0  }
  0x17   :  { %s3594_s23 = smov 0   ;;  %s3596_s24 = smov 0  }
  0x18   :  { %s3598_s25 = smov 0   ;;  %s3600_s26 = smov 0  }
  0x19   :  { %s3602_s27 = smov 0   ;;  %s3604_s28 = smov 0  }
  0x1a   :  { %s3606_s29 = smov 0   ;;  %s3608_s30 = smov 0  }
  0x1b   :  { %s3610_s0 = smov 0  }
  0x1c LB: > { %4551 = sst [smem:[#allocation29_spill]] %s3428_s21  ;;  %s3646_s17 = sadd.s32 4294967295, %s3468_s0   ;;  %s3468_s0 = sphi %s3610_s0, %s34_s0   ;;  %s3464_s30 = sphi %s3608_s30, %s4635_s30   ;;  %s3460_s29 = sphi %s3606_s29, %s4641_s29   ;;  %s3456_s28 = sphi %s3604_s28, %s4640_s28   ;;  %s3452_s27 = sphi %s3602_s27, %s4639_s27   ;;  %s3448_s26 = sphi %s3600_s26, %s4638_s26   ;;  %s3444_s25 = sphi %s3598_s25, %s4637_s25   ;;  %s3440_s24 = sphi %s3596_s24, %s4636_s24   ;;  %s3436_s23 = sphi %s3594_s23, %s4630_s23   ;;  %s3432_s22 = sphi %s3592_s22, %s4629_s22   ;;  %s3428_s21 = sphi %s3590_s21, %s4628_s21  }
  0x1d   : > { %4552 = sst [smem:[#allocation30_spill]] %s3432_s22  ;;  %s2368_s18 = sadd.s32 4294967294, %s3468_s0  }
  0x1e   : > { %4553 = sst [smem:[#allocation31_spill]] %s3436_s23  ;;  %s43_s19 = sadd.s32 1, %s3460_s29 }
  0x1f   : > { %4554 = sst [smem:[#allocation32_spill]] %s3448_s26  ;;  %s46_s20 = sadd.s32 1, %s3464_s30 }
  0x20   : > { %4555 = sst [smem:[#allocation33_spill]] %s3452_s27  ;;  %p44_p0 = scmp.ge.s32.totalorder %s43_s19, 2 }
  0x21   : > { %4556 = sst [smem:[#allocation34_spill]] %s3456_s28  ;;  %s53_s16 = sadd.s32 1, %s3448_s26 }
  0x22   : > { %4557 = sst [smem:[#allocation35_spill]] %s3464_s30  ;;  %p60_p1 = scmp.ne.s32.totalorder %s3448_s26, %s3444_s25 }
  0x23   : > { %p61_p2 = scmp.eq.s32.totalorder %s3468_s0, 0  ;;  %s4643_s19 = smov (%p44_p0, %s43_s19), 0 }
  0x24   : > { %4558 = sst [smem:[#allocation36_spill]] %s4643_s19  ;;  %s4645_s20 = smov (!%p44_p0, %s46_s20), %s3464_s30 }
  0x25   : > { %p3663_p3 = por %p61_p2, %p60_p1  ;;  %p4516_p4 = scmp.ne.s32.totalorder %s3444_s25, %s3440_s24 }
  0x26   : > { %p48_p5 = scmp.ge.s32.totalorder %s4645_s20, 2  ;;  %s139_s27 = ssub.s32 %s3460_s29, %s4643_s19 }
  0x27   : > { %p140_p6 = scmp.eq.s32.totalorder %s139_s27, 0  ;;  %s142_s15 = sadd.s32 1, %s3436_s23 }
  0x28   : > { %s4647_s20 = smov (%p48_p5, %s4645_s20), 0  ;;  %p149_p7 = scmp.ne.s32.totalorder %s3436_s23, %s3432_s22 }
  0x29   : > { %4560 = sst [smem:[#allocation37_spill]] %s4647_s20  ;;  %s50_s2 = ssub.s32 %s3464_s30, %s4647_s20 }
  0x2a   : > { %s3675_s3 = scalar_select %p140_p6, %s3436_s23, %s142_s15  }
  0x2b   : > { %p51_p8 = scmp.eq.s32.totalorder %s50_s2, 0  ;;  %p3685_p10 = por %p149_p7, %p61_p2 }
  0x2c   : > { %4561 = sst [smem:[#allocation38_spill]] %s3675_s3  ;;  %p465_p11 = scmp.eq.s32.totalorder %s3646_s17, 3 }
  0x2d   : > { %s3691_s27 = scalar_select %p51_p8, %s3448_s26, %s53_s16  }
  0x2e   : > { %p3696_p12 = por %p465_p11, %p60_p1  ;;  %p471_p13 = scmp.eq.s32.totalorder %s2368_s18, 3 }
  0x2f   : > { %4563 = sst [smem:[#allocation39_spill]] %s3691_s27  ;;  %p2700_p2 = scmp.lt.s32.totalorder %s3468_s0, 4 }
  0x30   : > { %s4564_s19 = scalar_select %p3696_p12, 1, 0 }
  0x31   : > { %p3703_p0 = por %p471_p13, %p4516_p4  ;;  %s524_s15 = sand.u32 1, %s3468_s0  }
  0x32   : > { %4565 = sst [smem:[#allocation40_spill]] %s4564_s19  ;;  %s526_s20 = sand.u32 1, %s3448_s26  }
  0x33   : > { %s4566_s2 = scalar_select %p3703_p0, 1, 0 }
  0x34   : > { %s2374_s3 = sshll.u32 %s526_s20, 3  ;;  %s2375_s14 = sshll.u32 %s3464_s30, 7 }
  0x35   : > { %4567 = sst [smem:[#allocation41_spill]] %s4566_s2  ;;  %s4568_s16 = sld [smem:[#allocation42_spill]] }
  0x36   : > { %s528_s19 = scalar_lea.vmem [#allocation3], %s2374_s3  ;;  %p3720_p1 = pnand %p2700_p2, %p3663_p3 }
  0x37   : > { %s535_s18 = sshll.u32 %s528_s19, 4  ;;  %s3725_s20 = sand.u32 1, %s3436_s23   ;;  %s3716_s18 = int_to_ptr.vmem [resolvable:$true] %s535_s18 }
  0x38   : > { %p3729_p5 = pnand %p2700_p2, %p3685_p10  ;;  %s3733_s21 = scalar_lea.sflag [#allocation4], %s524_s15 }
  0x39   : > { %p2862_p7 = pneg %p3720_p1 }
  0x3b   : > { %s3714_s27 = scalar_lea.hbm %s4568_s16, %s2375_s14  ;;  %s2865_s19 = scalar_lea.hbm %s4568_s16, 256 }
  0x3c   : > { %s4570_s14 = scalar_select %p3729_p5, 1, 0 }
  0x3d   : > { %s2860_s3 = scalar_lea.hbm %s3714_s27, 128  ;;  %p2866_p10 = scmp.lt.u32.totalorder %s3714_s27, %s4568_s16 }
  0x3e   : > { %p2861_p6 = scmp.ne.s32.totalorder %s3714_s27, %s2860_s3  ;;  %p2867_p11 = scmp.lt.u32.totalorder %s2865_s19, %s2860_s3 }
  0x3f   : > { %p2869_p2 = scmp.lt.u32.totalorder %s2860_s3, %s3714_s27 }
  0x40   : > { %p2863_p3 = pnand %p2862_p7, %p2861_p6  ;;  %p2868_p13 = por %p2867_p11, %p2866_p10 }
  0x42   : > { %p2864_p8 = pneg %p2863_p3  ;;  %p2870_p9 = por %p2869_p2, %p2868_p13 }
  0x44   : > { %p2871_p4 = pnand %p2870_p9, %p2864_p8 }
  0x46   : > { %2874 = shalt.err (!%p2871_p4)
}
  0x47   : > { %s2875_s15 = scalar_lea.vmem %s3716_s18, 128  ;;  %s3470_s22 = smov [#allocation3]  }
  0x48   : > { %p2876_p6 = scmp.ne.s32.totalorder %s3716_s18, %s2875_s15  ;;  %s2880_s28 = sshll.u32 %s3470_s22, 4  ;;  %s2881_s28 = int_to_ptr.vmem [resolvable:$false] %s2880_s28 }
  0x49   : > { %s2882_s30 = scalar_lea.vmem %s2881_s28, 256  ;;  %p2883_p12 = scmp.lt.s32.totalorder %s3716_s18, %s2881_s28 }
  0x4a   : > { %p2878_p3 = pnand %p2876_p6, %p2862_p7  ;;  %p2884_p10 = scmp.lt.s32.totalorder %s2882_s30, %s2875_s15 }
  0x4c   : > { %p2879_p0 = pneg %p2878_p3  ;;  %p2885_p11 = por %p2884_p10, %p2883_p12 }
  0x4e   : > { %p2886_p13 = pnand %p2885_p11, %p2879_p0 }
  0x50   : > { %2889 = shalt.err (!%p2886_p13)
}
  0x51   : > { %2656 = dma.hbm_to_vmem [thread:$0]  (!%p3720_p1), %s3714_s27, 128, %s3716_s18, %s3733_s21  }
  0x52   : > { %s3762_s3 = sshll.u32 %s3460_s29, 4  ;;  %s4571_s4 = sld [smem:[#allocation46_spill]] }
  0x53   : > { %s545_s2 = scalar_lea.vmem [#allocation11], %s3725_s20  ;;  %p3775_p9 = pneg %p3729_p5 }
  0x54   : > { %s552_s15 = sshll.u32 %s545_s2, 4  ;;  %s553_s15 = int_to_ptr.vmem [resolvable:$true] %s552_s15 }
  0x55   : > { %s4572_s27 = scalar_select %p3775_p9, 1, 0 }
  0x58   : > { %s3768_s22 = scalar_lea.hbm %s4571_s4, %s3762_s3  ;;  %s2895_s19 = scalar_lea.hbm %s4571_s4, 32 }
  0x59   : > { %s2890_s28 = scalar_lea.hbm %s3768_s22, 16  ;;  %p2896_p1 = scmp.lt.u32.totalorder %s3768_s22, %s4571_s4 }
  0x5a   : > { %p2891_p4 = scmp.ne.s32.totalorder %s3768_s22, %s2890_s28  ;;  %p2897_p7 = scmp.lt.u32.totalorder %s2895_s19, %s2890_s28 }
  0x5b   : > { %p2899_p2 = scmp.lt.u32.totalorder %s2890_s28, %s3768_s22 }
  0x5c   : > { %p2893_p12 = pnand %p3775_p9, %p2891_p4  ;;  %p2898_p8 = por %p2897_p7, %p2896_p1 }
  0x5e   : > { %p2894_p0 = pneg %p2893_p12  ;;  %p2900_p6 = por %p2899_p2, %p2898_p8 }
  0x60   : > { %p2901_p3 = pnand %p2900_p6, %p2894_p0 }
  0x62   : > { %2904 = shalt.err (!%p2901_p3)
}
  0x63   : > { %s2905_s2 = scalar_lea.vmem %s553_s15, 16  ;;  %s3471_s26 = smov [#allocation11]  }
  0x64   : > { %p2906_p10 = scmp.ne.s32.totalorder %s553_s15, %s2905_s2  ;;  %s2910_s23 = sshll.u32 %s3471_s26, 4  ;;  %s2911_s23 = int_to_ptr.vmem [resolvable:$false] %s2910_s23 }
  0x65   : > { %s2912_s18 = scalar_lea.vmem %s2911_s23, 32  ;;  %p2913_p4 = scmp.lt.s32.totalorder %s553_s15, %s2911_s23 }
  0x66   : > { %p2908_p11 = pnand %p2906_p10, %p3775_p9  ;;  %p2914_p12 = scmp.lt.s32.totalorder %s2912_s18, %s2905_s2 }
  0x68   : > { %p2909_p13 = pneg %p2908_p11  ;;  %p2915_p5 = por %p2914_p12, %p2913_p4 }
  0x6a   : > { %p2916_p1 = pnand %p2915_p5, %p2909_p13 }
  0x6c   : > { %2919 = shalt.err (!%p2916_p1)
}
  0x6d   : > { %p4573_p7 = scmp.ne.s32.totalorder %s4570_s14, 0  ;;  %s4574_s5 = sld [smem:[#allocation47_spill]] }
  0x6e   : > { %s562_s23 = scalar_lea.vmem [#allocation12], %s3725_s20 }
  0x6f   : > { %2659 = dma.hbm_to_vmem [thread:$0]  (!%p4573_p7), %s3768_s22, 16, %s553_s15, %s3733_s21  }
  0x70   : > { %s569_s30 = sshll.u32 %s562_s23, 4  ;;  %s570_s30 = int_to_ptr.vmem [resolvable:$true] %s569_s30 }
  0x73   : > { %s3799_s26 = scalar_lea.hbm %s4574_s5, %s3762_s3  ;;  %s2925_s15 = scalar_lea.hbm %s4574_s5, 32 }
  0x74   : > { %s2920_s1 = scalar_lea.hbm %s3799_s26, 16  ;;  %p2926_p2 = scmp.lt.u32.totalorder %s3799_s26, %s4574_s5 }
  0x75   : > { %p2921_p5 = scmp.ne.s32.totalorder %s3799_s26, %s2920_s1  ;;  %p2927_p6 = scmp.lt.u32.totalorder %s2925_s15, %s2920_s1 }
  0x76   : > { %p2929_p10 = scmp.lt.u32.totalorder %s2920_s1, %s3799_s26 }
  0x77   : > { %p2923_p0 = pnand %p2921_p5, %p3775_p9  ;;  %p2928_p3 = por %p2927_p6, %p2926_p2 }
  0x79   : > { %p2924_p8 = pneg %p2923_p0  ;;  %p2930_p11 = por %p2929_p10, %p2928_p3 }
  0x7b   : > { %p2931_p13 = pnand %p2930_p11, %p2924_p8 }
  0x7d   : > { %2934 = shalt.err (!%p2931_p13)
}
  0x7e   : > { %s2935_s28 = scalar_lea.vmem %s570_s30, 16  ;;  %s3472_s23 = smov [#allocation12]  }
  0x7f   : > { %p2936_p4 = scmp.ne.s32.totalorder %s570_s30, %s2935_s28  ;;  %s2940_s19 = sshll.u32 %s3472_s23, 4  ;;  %s2941_s19 = int_to_ptr.vmem [resolvable:$false] %s2940_s19 }
  0x80   : > { %s2942_s2 = scalar_lea.vmem %s2941_s19, 32  ;;  %p2943_p5 = scmp.lt.s32.totalorder %s570_s30, %s2941_s19 }
  0x81   : > { %p2938_p12 = pnand %p2936_p4, %p3775_p9  ;;  %p2944_p0 = scmp.lt.s32.totalorder %s2942_s2, %s2935_s28 }
  0x83   : > { %p2939_p1 = pneg %p2938_p12  ;;  %p2945_p7 = por %p2944_p0, %p2943_p5 }
  0x85   : > { %p2946_p2 = pnand %p2945_p7, %p2939_p1 }
  0x87   : > { %2949 = shalt.err (!%p2946_p2)
}
  0x88   : > { %p4575_p6 = scmp.ne.s32.totalorder %s4570_s14, 0  ;;  %s2451_s1 = sshll.u32 %s3460_s29, 8 }
  0x89   : > { %s4576_s6 = sld [smem:[#allocation48_spill]]  ;;  %s4577_s19 = sshll.u32 %s3725_s20, 4 }
  0x8a   : > { %2662 = dma.hbm_to_vmem [thread:$0]  (!%p4575_p6), %s3799_s26, 16, %s570_s30, %s3733_s21  }
  0x8b   : > { %s580_s16 = scalar_lea.vmem [#allocation13], %s4577_s19 }
  0x8c   : > { %s587_s28 = sshll.u32 %s580_s16, 4  ;;  %s3831_s28 = int_to_ptr.vmem [resolvable:$true] %s587_s28 }
  0x8f   : > { %s3827_s18 = scalar_lea.hbm %s4576_s6, %s2451_s1  ;;  %s2955_s2 = scalar_lea.hbm %s4576_s6, 512 }
  0x90   : > { %s2950_s23 = scalar_lea.hbm %s3827_s18, 256  ;;  %p2956_p10 = scmp.lt.u32.totalorder %s3827_s18, %s4576_s6 }
  0x91   : > { %p2951_p7 = scmp.ne.s32.totalorder %s3827_s18, %s2950_s23  ;;  %p2957_p11 = scmp.lt.u32.totalorder %s2955_s2, %s2950_s23 }
  0x92   : > { %p2959_p4 = scmp.lt.u32.totalorder %s2950_s23, %s3827_s18 }
  0x93   : > { %p2953_p8 = pnand %p2951_p7, %p3775_p9  ;;  %p2958_p13 = por %p2957_p11, %p2956_p10 }
  0x95   : > { %p2954_p3 = pneg %p2953_p8  ;;  %p2960_p12 = por %p2959_p4, %p2958_p13 }
  0x97   : > { %p2961_p1 = pnand %p2960_p12, %p2954_p3 }
  0x99   : > { %2964 = shalt.err (!%p2961_p1)
}
  0x9a   : > { %s2965_s19 = scalar_lea.vmem %s3831_s28, 256  ;;  %s3473_s16 = smov [#allocation13]  }
  0x9b   : > { %p2966_p5 = scmp.ne.s32.totalorder %s3831_s28, %s2965_s19  ;;  %s2970_s26 = sshll.u32 %s3473_s16, 4  ;;  %s2971_s26 = int_to_ptr.vmem [resolvable:$false] %s2970_s26 }
  0x9c   : > { %s2972_s30 = scalar_lea.vmem %s2971_s26, 512  ;;  %p2973_p7 = scmp.lt.s32.totalorder %s3831_s28, %s2971_s26 }
  0x9d   : > { %p2968_p0 = pnand %p2966_p5, %p3775_p9  ;;  %p2974_p8 = scmp.lt.s32.totalorder %s2972_s30, %s2965_s19 }
  0x9f   : > { %p2969_p2 = pneg %p2968_p0  ;;  %p2975_p10 = por %p2974_p8, %p2973_p7 }
  0xa1   : > { %p2976_p11 = pnand %p2975_p10, %p2969_p2 }
  0xa3   : > { %2979 = shalt.err (!%p2976_p11)
}
  0xa4   : > { %s4523_s23 = smov 64   ;;  %s4525_s2 = smov 4  }
  0xa5   : > { %2665 = dma.hbm_to_vmem [thread:$0]  (!%p4575_p6), %s3827_s18, 256, %s3831_s28, %s3733_s21, %s4523_s23, %s4523_s23, %s4525_s2  }
  0xa6   : > { %s4578_s7 = sld [smem:[#allocation49_spill]]  ;;  %s4579_s16 = sshll.u32 %s3725_s20, 4 }
  0xa7   : > { %s601_s26 = scalar_lea.vmem [#allocation14], %s4579_s16 }
  0xa8   : > { %s608_s30 = sshll.u32 %s601_s26, 4  ;;  %s3867_s30 = int_to_ptr.vmem [resolvable:$true] %s608_s30 }
  0xac   : > { %s3863_s19 = scalar_lea.hbm %s4578_s7, %s2451_s1  ;;  %s2985_s22 = scalar_lea.hbm %s4578_s7, 512 }
  0xad   : > { %s2980_s4 = scalar_lea.hbm %s3863_s19, 256  ;;  %p2986_p12 = scmp.lt.u32.totalorder %s3863_s19, %s4578_s7 }
  0xae   : > { %p2981_p3 = scmp.ne.s32.totalorder %s3863_s19, %s2980_s4  ;;  %p2987_p1 = scmp.lt.u32.totalorder %s2985_s22, %s2980_s4 }
  0xaf   : > { %p2989_p0 = scmp.lt.u32.totalorder %s2980_s4, %s3863_s19 }
  0xb0   : > { %p2983_p13 = pnand %p2981_p3, %p3775_p9  ;;  %p2988_p5 = por %p2987_p1, %p2986_p12 }
  0xb2   : > { %p2984_p4 = pneg %p2983_p13  ;;  %p2990_p2 = por %p2989_p0, %p2988_p5 }
  0xb4   : > { %p2991_p7 = pnand %p2990_p2, %p2984_p4 }
  0xb6   : > { %2994 = shalt.err (!%p2991_p7)
}
  0xb7   : > { %s2995_s16 = scalar_lea.vmem %s3867_s30, 256  ;;  %s3476_s26 = smov [#allocation14]  }
  0xb8   : > { %p2996_p8 = scmp.ne.s32.totalorder %s3867_s30, %s2995_s16  ;;  %s3000_s18 = sshll.u32 %s3476_s26, 4  ;;  %s3001_s18 = int_to_ptr.vmem [resolvable:$false] %s3000_s18 }
  0xb9   : > { %s3002_s28 = scalar_lea.vmem %s3001_s18, 512  ;;  %p3003_p3 = scmp.lt.s32.totalorder %s3867_s30, %s3001_s18 }
  0xba   : > { %p2998_p10 = pnand %p2996_p8, %p3775_p9  ;;  %p3004_p13 = scmp.lt.s32.totalorder %s3002_s28, %s2995_s16 }
  0xbc   : > { %p2999_p11 = pneg %p2998_p10  ;;  %p3005_p12 = por %p3004_p13, %p3003_p3 }
  0xbe   : > { %p3006_p1 = pnand %p3005_p12, %p2999_p11 }
  0xc0   : > { %3009 = shalt.err (!%p3006_p1)
}
  0xc1   : > { %2668 = dma.hbm_to_vmem [thread:$0]  (!%p4575_p6), %s3863_s19, 256, %s3867_s30, %s3733_s21, %s4523_s23, %s4523_s23, %s4525_s2  }
  0xc2   : > { %s4580_s8 = sld [smem:[#allocation50_spill]]  ;;  %s621_s15 = scalar_lea.vmem [#allocation15], %s3725_s20 }
  0xc3   : > { %s628_s16 = sshll.u32 %s621_s15, 4  ;;  %s629_s16 = int_to_ptr.vmem [resolvable:$true] %s628_s16 }
  0xc8   : > { %s3898_s1 = scalar_lea.hbm %s4580_s8, %s3762_s3  ;;  %s3015_s19 = scalar_lea.hbm %s4580_s8, 32 }
  0xc9   : > { %s3010_s26 = scalar_lea.hbm %s3898_s1, 16  ;;  %p3016_p2 = scmp.lt.u32.totalorder %s3898_s1, %s4580_s8 }
  0xca   : > { %p3011_p4 = scmp.ne.s32.totalorder %s3898_s1, %s3010_s26  ;;  %p3017_p7 = scmp.lt.u32.totalorder %s3015_s19, %s3010_s26 }
  0xcb   : > { %p3019_p10 = scmp.lt.u32.totalorder %s3010_s26, %s3898_s1 }
  0xcc   : > { %p3013_p5 = pnand %p3011_p4, %p3775_p9  ;;  %p3018_p8 = por %p3017_p7, %p3016_p2 }
  0xce   : > { %p3014_p0 = pneg %p3013_p5  ;;  %p3020_p11 = por %p3019_p10, %p3018_p8 }
  0xd0   : > { %p3021_p3 = pnand %p3020_p11, %p3014_p0 }
  0xd2   : > { %3024 = shalt.err (!%p3021_p3)
}
  0xd3   : > { %s3025_s22 = scalar_lea.vmem %s629_s16, 16  ;;  %s3477_s15 = smov [#allocation15]  }
  0xd4   : > { %p3026_p13 = scmp.ne.s32.totalorder %s629_s16, %s3025_s22  ;;  %s3030_s23 = sshll.u32 %s3477_s15, 4  ;;  %s3031_s23 = int_to_ptr.vmem [resolvable:$false] %s3030_s23 }
  0xd5   : > { %s3032_s18 = scalar_lea.vmem %s3031_s23, 32  ;;  %p3033_p4 = scmp.lt.s32.totalorder %s629_s16, %s3031_s23 }
  0xd6   : > { %p3028_p12 = pnand %p3026_p13, %p3775_p9  ;;  %p3034_p5 = scmp.lt.s32.totalorder %s3032_s18, %s3025_s22 }
  0xd8   : > { %p3029_p1 = pneg %p3028_p12  ;;  %p3035_p6 = por %p3034_p5, %p3033_p4 }
  0xda   : > { %p3036_p2 = pnand %p3035_p6, %p3029_p1 }
  0xdc   : > { %3039 = shalt.err (!%p3036_p2)
}
  0xdd   : > { %p4581_p7 = scmp.ne.s32.totalorder %s4570_s14, 0  ;;  %s4582_s9 = sld [smem:[#allocation51_spill]] }
  0xde   : > { %s638_s23 = scalar_lea.vmem [#allocation16], %s3725_s20 }
  0xdf   : > { %2671 = dma.hbm_to_vmem [thread:$0]  (!%p4581_p7), %s3898_s1, 16, %s629_s16, %s3733_s21  }
  0xe0   : > { %s645_s30 = sshll.u32 %s638_s23, 4  ;;  %s646_s30 = int_to_ptr.vmem [resolvable:$true] %s645_s30 }
  0xe3   : > { %s3923_s19 = scalar_lea.hbm %s4582_s9, %s3762_s3  ;;  %s3045_s1 = scalar_lea.hbm %s4582_s9, 32 }
  0xe4   : > { %s3040_s4 = scalar_lea.hbm %s3923_s19, 16  ;;  %p3046_p10 = scmp.lt.u32.totalorder %s3923_s19, %s4582_s9 }
  0xe5   : > { %p3041_p6 = scmp.ne.s32.totalorder %s3923_s19, %s3040_s4  ;;  %p3047_p11 = scmp.lt.u32.totalorder %s3045_s1, %s3040_s4 }
  0xe6   : > { %p3049_p13 = scmp.lt.u32.totalorder %s3040_s4, %s3923_s19 }
  0xe7   : > { %p3043_p0 = pnand %p3041_p6, %p3775_p9  ;;  %p3048_p3 = por %p3047_p11, %p3046_p10 }
  0xe9   : > { %p3044_p8 = pneg %p3043_p0  ;;  %p3050_p12 = por %p3049_p13, %p3048_p3 }
  0xeb   : > { %p3051_p1 = pnand %p3050_p12, %p3044_p8 }
  0xed   : > { %3054 = shalt.err (!%p3051_p1)
}
  0xee   : > { %s3055_s26 = scalar_lea.vmem %s646_s30, 16  ;;  %s3478_s28 = smov [#allocation16]  }
  0xef   : > { %p3056_p4 = scmp.ne.s32.totalorder %s646_s30, %s3055_s26  ;;  %s3060_s23 = sshll.u32 %s3478_s28, 4  ;;  %s3061_s23 = int_to_ptr.vmem [resolvable:$false] %s3060_s23 }
  0xf0   : > { %s3062_s22 = scalar_lea.vmem %s3061_s23, 32  ;;  %p3063_p6 = scmp.lt.s32.totalorder %s646_s30, %s3061_s23 }
  0xf1   : > { %p3058_p5 = pnand %p3056_p4, %p3775_p9  ;;  %p3064_p0 = scmp.lt.s32.totalorder %s3062_s22, %s3055_s26 }
  0xf3   : > { %p3059_p2 = pneg %p3058_p5  ;;  %p3065_p7 = por %p3064_p0, %p3063_p6 }
  0xf5   : > { %p3066_p10 = pnand %p3065_p7, %p3059_p2 }
  0xf7   : > { %3069 = shalt.err (!%p3066_p10)
}
  0xf8   : > { %p4583_p11 = scmp.ne.s32.totalorder %s4570_s14, 0  ;;  %s4584_s10 = sld [smem:[#allocation52_spill]] }
  0xf9   : > { %s655_s16 = scalar_lea.vmem [#allocation17], %s3725_s20 }
  0xfa   : > { %2674 = dma.hbm_to_vmem [thread:$0]  (!%p4583_p11), %s3923_s19, 16, %s646_s30, %s3733_s21  }
  0xfb   : > { %s662_s18 = sshll.u32 %s655_s16, 4  ;;  %s663_s18 = int_to_ptr.vmem [resolvable:$true] %s662_s18 }
  0xfe   : > { %s3948_s1 = scalar_lea.hbm %s4584_s10, %s3762_s3  ;;  %s3075_s19 = scalar_lea.hbm %s4584_s10, 32 }
  0xff   : > { %s3070_s26 = scalar_lea.hbm %s3948_s1, 16  ;;  %p3076_p13 = scmp.lt.u32.totalorder %s3948_s1, %s4584_s10 }
 0x100   : > { %p3071_p7 = scmp.ne.s32.totalorder %s3948_s1, %s3070_s26  ;;  %p3077_p12 = scmp.lt.u32.totalorder %s3075_s19, %s3070_s26 }
 0x101   : > { %p3079_p4 = scmp.lt.u32.totalorder %s3070_s26, %s3948_s1 }
 0x102   : > { %p3073_p8 = pnand %p3071_p7, %p3775_p9  ;;  %p3078_p1 = por %p3077_p12, %p3076_p13 }
 0x104   : > { %p3074_p3 = pneg %p3073_p8  ;;  %p3080_p5 = por %p3079_p4, %p3078_p1 }
 0x106   : > { %p3081_p2 = pnand %p3080_p5, %p3074_p3 }
 0x108   : > { %3084 = shalt.err (!%p3081_p2)
}
 0x109   : > { %s3085_s4 = scalar_lea.vmem %s663_s18, 16  ;;  %s3479_s15 = smov [#allocation17]  }
 0x10a   : > { %p3086_p6 = scmp.ne.s32.totalorder %s663_s18, %s3085_s4  ;;  %s3090_s16 = sshll.u32 %s3479_s15, 4  ;;  %s3091_s16 = int_to_ptr.vmem [resolvable:$false] %s3090_s16 }
 0x10b   : > { %s3092_s28 = scalar_lea.vmem %s3091_s16, 32  ;;  %p3093_p7 = scmp.lt.s32.totalorder %s663_s18, %s3091_s16 }
 0x10c   : > { %p3088_p0 = pnand %p3086_p6, %p3775_p9  ;;  %p3094_p8 = scmp.lt.s32.totalorder %s3092_s28, %s3085_s4 }
 0x10e   : > { %p3089_p10 = pneg %p3088_p0  ;;  %p3095_p11 = por %p3094_p8, %p3093_p7 }
 0x110   : > { %p3096_p12 = pnand %p3095_p11, %p3089_p10 }
 0x112   : > { %3099 = shalt.err (!%p3096_p12)
}
 0x113   : > { %p4585_p13 = scmp.ne.s32.totalorder %s4570_s14, 0  ;;  %s4586_s11 = sld [smem:[#allocation53_spill]] }
 0x114   : > { %s672_s30 = scalar_lea.vmem [#allocation18], %s3725_s20  ;;  %s2388_s4 = sshll.u32 %s3725_s20, 5 }
 0x115   : > { %2677 = dma.hbm_to_vmem [thread:$0]  (!%p4585_p13), %s3948_s1, 16, %s663_s18, %s3733_s21  }
 0x116   : > { %s679_s22 = sshll.u32 %s672_s30, 4  ;;  %s680_s22 = int_to_ptr.vmem [resolvable:$true] %s679_s22 }
 0x119   : > { %s3973_s19 = scalar_lea.hbm %s4586_s11, %s3762_s3  ;;  %s3105_s18 = scalar_lea.hbm %s4586_s11, 32 }
 0x11a   : > { %s3100_s15 = scalar_lea.hbm %s3973_s19, 16  ;;  %p3106_p4 = scmp.lt.u32.totalorder %s3973_s19, %s4586_s11 }
 0x11b   : > { %p3101_p11 = scmp.ne.s32.totalorder %s3973_s19, %s3100_s15  ;;  %p3107_p5 = scmp.lt.u32.totalorder %s3105_s18, %s3100_s15 }
 0x11c   : > { %p3109_p6 = scmp.lt.u32.totalorder %s3100_s15, %s3973_s19 }
 0x11d   : > { %p3103_p3 = pnand %p3101_p11, %p3775_p9  ;;  %p3108_p2 = por %p3107_p5, %p3106_p4 }
 0x11f   : > { %p3104_p1 = pneg %p3103_p3  ;;  %p3110_p0 = por %p3109_p6, %p3108_p2 }
 0x121   : > { %p3111_p10 = pnand %p3110_p0, %p3104_p1 }
 0x123   : > { %3114 = shalt.err (!%p3111_p10)
}
 0x124   : > { %s3115_s23 = scalar_lea.vmem %s680_s22, 16  ;;  %s3480_s30 = smov [#allocation18]  }
 0x125   : > { %p3116_p7 = scmp.ne.s32.totalorder %s680_s22, %s3115_s23  ;;  %s3120_s2 = sshll.u32 %s3480_s30, 4  ;;  %s3121_s2 = int_to_ptr.vmem [resolvable:$false] %s3120_s2 }
 0x126   : > { %s3122_s16 = scalar_lea.vmem %s3121_s2, 32  ;;  %p3123_p11 = scmp.lt.s32.totalorder %s680_s22, %s3121_s2 }
 0x127   : > { %p3118_p8 = pnand %p3116_p7, %p3775_p9  ;;  %p3124_p3 = scmp.lt.s32.totalorder %s3122_s16, %s3115_s23 }
 0x129   : > { %p3119_p12 = pneg %p3118_p8  ;;  %p3125_p13 = por %p3124_p3, %p3123_p11 }
 0x12b   : > { %p3126_p4 = pnand %p3125_p13, %p3119_p12 }
 0x12d   : > { %3129 = shalt.err (!%p3126_p4)
}
 0x12e   : > { %p4587_p5 = scmp.ne.s32.totalorder %s4570_s14, 0  ;;  %s2453_s15 = sshll.u32 %s3460_s29, 9 }
 0x12f   : > { %s4588_s12 = sld [smem:[#allocation54_spill]]  ;;  %s690_s2 = scalar_lea.vmem [#allocation19], %s2388_s4 }
 0x130   : > { %2680 = dma.hbm_to_vmem [thread:$0]  (!%p4587_p5), %s3973_s19, 16, %s680_s22, %s3733_s21  }
 0x131   : > { %s697_s26 = sshll.u32 %s690_s2, 4  ;;  %s4003_s26 = int_to_ptr.vmem [resolvable:$true] %s697_s26 }
 0x135   : > { %s3999_s28 = scalar_lea.hbm %s4588_s12, %s2453_s15  ;;  %s3135_s30 = scalar_lea.hbm %s4588_s12, 1024 }
 0x136   : > { %s3130_s23 = scalar_lea.hbm %s3999_s28, 512  ;;  %p3136_p6 = scmp.lt.u32.totalorder %s3999_s28, %s4588_s12 }
 0x137   : > { %p3131_p13 = scmp.ne.s32.totalorder %s3999_s28, %s3130_s23  ;;  %p3137_p0 = scmp.lt.u32.totalorder %s3135_s30, %s3130_s23 }
 0x138   : > { %p3139_p7 = scmp.lt.u32.totalorder %s3130_s23, %s3999_s28 }
 0x139   : > { %p3133_p1 = pnand %p3131_p13, %p3775_p9  ;;  %p3138_p10 = por %p3137_p0, %p3136_p6 }
 0x13b   : > { %p3134_p2 = pneg %p3133_p1  ;;  %p3140_p8 = por %p3139_p7, %p3138_p10 }
 0x13d   : > { %p3141_p12 = pnand %p3140_p8, %p3134_p2 }
 0x13f   : > { %3144 = shalt.err (!%p3141_p12)
}
 0x140   : > { %s3145_s4 = scalar_lea.vmem %s4003_s26, 512  ;;  %s3481_s1 = smov [#allocation19]  }
 0x141   : > { %p3146_p11 = scmp.ne.s32.totalorder %s4003_s26, %s3145_s4  ;;  %s3150_s18 = sshll.u32 %s3481_s1, 4  ;;  %s3151_s18 = int_to_ptr.vmem [resolvable:$false] %s3150_s18 }
 0x142   : > { %s3152_s2 = scalar_lea.vmem %s3151_s18, 1024  ;;  %p3153_p13 = scmp.lt.s32.totalorder %s4003_s26, %s3151_s18 }
 0x143   : > { %p3148_p3 = pnand %p3146_p11, %p3775_p9  ;;  %p3154_p1 = scmp.lt.s32.totalorder %s3152_s2, %s3145_s4 }
 0x145   : > { %p3149_p4 = pneg %p3148_p3  ;;  %p3155_p6 = por %p3154_p1, %p3153_p13 }
 0x147   : > { %p3156_p0 = pnand %p3155_p6, %p3149_p4 }
 0x149   : > { %3159 = shalt.err (!%p3156_p0)
}
 0x14a   : > { %s3482_s23 = smov 128   ;;  %s3483_s19 = smov 8  }
 0x14b   : > { %2683 = dma.hbm_to_vmem [thread:$0]  (!%p4587_p5), %s3999_s28, 512, %s4003_s26, %s3733_s21, %s3482_s23, %s3482_s23, %s3483_s19  }
 0x14c   : > { %s4031_s16 = scalar_lea.hbm %s4497_s13, %s3762_s3  ;;  %s710_s15 = scalar_lea.vmem [#allocation20], %s3725_s20 }
 0x14d   : > { %s717_s4 = sshll.u32 %s710_s15, 4  ;;  %s3160_s1 = scalar_lea.hbm %s4031_s16, 16  ;;  %s718_s4 = int_to_ptr.vmem [resolvable:$true] %s717_s4 }
 0x14e   : > { %p3161_p2 = scmp.ne.s32.totalorder %s4031_s16, %s3160_s1  ;;  %s3165_s28 = scalar_lea.hbm %s4497_s13, 32 }
 0x14f   : > { %p3166_p8 = scmp.lt.u32.totalorder %s4031_s16, %s4497_s13  ;;  %p3167_p12 = scmp.lt.u32.totalorder %s3165_s28, %s3160_s1 }
 0x150   : > { %p3163_p10 = pnand %p3161_p2, %p3775_p9  ;;  %p3169_p3 = scmp.lt.u32.totalorder %s3160_s1, %s4031_s16 }
 0x151   : > { %p3168_p11 = por %p3167_p12, %p3166_p8 }
 0x152   : > { %p3164_p7 = pneg %p3163_p10 }
 0x153   : > { %p3170_p4 = por %p3169_p3, %p3168_p11 }
 0x155   : > { %p3171_p13 = pnand %p3170_p4, %p3164_p7 }
 0x157   : > { %3174 = shalt.err (!%p3171_p13)
}
 0x158   : > { %s3175_s19 = scalar_lea.vmem %s718_s4, 16  ;;  %s3484_s22 = smov [#allocation20]  }
 0x159   : > { %p3176_p1 = scmp.ne.s32.totalorder %s718_s4, %s3175_s19  ;;  %s3180_s30 = sshll.u32 %s3484_s22, 4  ;;  %s3181_s30 = int_to_ptr.vmem [resolvable:$false] %s3180_s30 }
 0x15a   : > { %s3182_s15 = scalar_lea.vmem %s3181_s30, 32  ;;  %p3183_p2 = scmp.lt.s32.totalorder %s718_s4, %s3181_s30 }
 0x15b   : > { %p3178_p6 = pnand %p3176_p1, %p3775_p9  ;;  %p3184_p10 = scmp.lt.s32.totalorder %s3182_s15, %s3175_s19 }
 0x15d   : > { %p3179_p0 = pneg %p3178_p6  ;;  %p3185_p5 = por %p3184_p10, %p3183_p2 }
 0x15f   : > { %p3186_p8 = pnand %p3185_p5, %p3179_p0 }
 0x161   : > { %3189 = shalt.err (!%p3186_p8)
}
 0x162   : > { %p4589_p12 = scmp.ne.s32.totalorder %s4570_s14, 0  ;;  %s4590_s1 = sld [smem:[#allocation30_spill]] }
 0x163   : > { %s4591_s18 = sld [smem:[#allocation29_spill]]  ;;  %p4527_p7 = scmp.eq.s32.totalorder %s3646_s17, 0 }
 0x164   : > { %2686 = dma.hbm_to_vmem [thread:$0]  (!%p4589_p12), %s4031_s16, 16, %s718_s4, %s3733_s21  }
 0x165   : > { %p2369_p5 = scmp.ge.s32.totalorder %s3468_s0, 1  ;;  %p478_p11 = scmp.lt.s32.totalorder %s3468_s0, 5 }
 0x166   : > { %p4592_p3 = scmp.ne.s32.totalorder %s3444_s25, %s3440_s24  ;;  %s3485_s16 = smov [#allocation6]  }
 0x167   : > { %p4073_p6 = pnand %p2369_p5, %p478_p11  ;;  %s491_s4 = sshll.u32 %s3485_s16, 4  ;;  %s4079_s4 = int_to_ptr.vmem [resolvable:$true] %s491_s4 }
 0x168   : > { %p4060_p4 = por %p4527_p7, %p4592_p3  ;;  %s4597_s22 = sld [smem:[#allocation55_spill]] }
 0x169   : > { %p4594_p13 = scmp.ne.s32.totalorder %s4590_s1, %s4591_s18  ;;  %p2643_p0 = pneg %p4073_p6 }
 0x16a   : > { %s4593_s2 = scalar_select %p4060_p4, 1, 0 }
 0x16b   : > { %p4069_p1 = por %p4594_p13, %p4527_p7  ;;  %s727_s1 = scalar_lea.vmem [#allocation21], %s3725_s20 }
 0x16c   : > { %s4596_s26 = scalar_select %p4073_p6, 1, 0 }
 0x16d   : > { %s4595_s28 = scalar_select %p4069_p1, 1, 0 }
 0x16e   : > { %s4598_s15 = smov %s4597_s22  ;;  %s4085_s30 = scalar_lea.hbm %s4597_s22, %s3762_s3 }
 0x16f   : > { %s734_s18 = sshll.u32 %s727_s1, 4  ;;  %p4090_p2 = pnand %p2643_p0, %p4527_p7  ;;  %s735_s18 = int_to_ptr.vmem [resolvable:$true] %s734_s18 }
 0x170   : > { %s3190_s16 = scalar_lea.hbm %s4085_s30, 16  ;;  %s3195_s19 = scalar_lea.hbm %s4598_s15, 32 }
 0x171   : > { %s4599_s5 = scalar_select %p4090_p2, 1, 0 }
 0x172   : > { %p3191_p10 = scmp.ne.s32.totalorder %s4085_s30, %s3190_s16  ;;  %p3196_p11 = scmp.lt.u32.totalorder %s4085_s30, %s4598_s15 }
 0x173   : > { %p3197_p3 = scmp.lt.u32.totalorder %s3195_s19, %s3190_s16  ;;  %p3199_p0 = scmp.lt.u32.totalorder %s3190_s16, %s4085_s30 }
 0x174   : > { %p3193_p8 = pnand %p3191_p10, %p3775_p9 }
 0x175   : > { %p3198_p13 = por %p3197_p3, %p3196_p11 }
 0x176   : > { %p3194_p5 = pneg %p3193_p8 }
 0x177   : > { %p3200_p7 = por %p3199_p0, %p3198_p13 }
 0x179   : > { %p3201_p1 = pnand %p3200_p7, %p3194_p5 }
 0x17b   : > { %3204 = shalt.err (!%p3201_p1)
}
 0x17c   : > { %s3205_s1 = scalar_lea.vmem %s735_s18, 16  ;;  %s3486_s7 = smov [#allocation21]  }
 0x17d   : > { %p3206_p4 = scmp.ne.s32.totalorder %s735_s18, %s3205_s1  ;;  %s3210_s8 = sshll.u32 %s3486_s7, 4  ;;  %s3211_s8 = int_to_ptr.vmem [resolvable:$false] %s3210_s8 }
 0x17e   : > { %s3212_s23 = scalar_lea.vmem %s3211_s8, 32  ;;  %p3213_p6 = scmp.lt.s32.totalorder %s735_s18, %s3211_s8 }
 0x17f   : > { %p3208_p10 = pnand %p3206_p4, %p3775_p9  ;;  %p3214_p2 = scmp.lt.s32.totalorder %s3212_s23, %s3205_s1 }
 0x181   : > { %p3209_p8 = pneg %p3208_p10  ;;  %p3215_p12 = por %p3214_p2, %p3213_p6 }
 0x183   : > { %p3216_p3 = pnand %p3215_p12, %p3209_p8 }
 0x185   : > { %3219 = shalt.err (!%p3216_p3)
}
 0x186   : > { %p4600_p11 = scmp.ne.s32.totalorder %s4570_s14, 0  ;;  %s4601_s3 = sld [smem:[#allocation43_spill]] }
 0x187   : > { %p4602_p4 = scmp.ne.s32.totalorder %s4599_s5, 0 }
 0x188   : > { %2689 = dma.hbm_to_vmem [thread:$0]  (!%p4600_p11), %s4085_s30, 16, %s735_s18, %s3733_s21  }
 0x189   : > { %p4120_p1 = pneg %p4602_p4 }
 0x18c   : > { %s3220_s19 = scalar_lea.hbm %s4601_s3, 128 }
 0x18d   : > { %p3221_p7 = scmp.ne.s32.totalorder %s4601_s3, %s3220_s19  ;;  %p3227_p2 = scmp.lt.u32.totalorder %s3220_s19, %s4601_s3 }
 0x18f   : > { %p3223_p12 = pnand %p4120_p1, %p3221_p7 }
 0x191   : > { %p3224_p6 = pneg %p3223_p12 }
 0x193   : > { %p3229_p5 = pnand %p3227_p2, %p3224_p6 }
 0x195   : > { %3232 = shalt.err (!%p3229_p5)
}
 0x196   : > { %s3233_s9 = scalar_lea.vmem %s4079_s4, 128  ;;  %p3241_p8 = scmp.lt.s32.totalorder %s4079_s4, %s4079_s4 }
 0x197   : > { %p3234_p13 = scmp.ne.s32.totalorder %s4079_s4, %s3233_s9  ;;  %p3242_p3 = scmp.lt.s32.totalorder %s3233_s9, %s3233_s9 }
 0x199   : > { %p3236_p0 = pnand %p3234_p13, %p4120_p1  ;;  %p3243_p7 = por %p3242_p3, %p3241_p8 }
 0x19b   : > { %p3237_p10 = pneg %p3236_p0 }
 0x19d   : > { %p3244_p12 = pnand %p3243_p7, %p3237_p10 }
 0x19f   : > { %3247 = shalt.err (!%p3244_p12)
}
 0x1a0   : > { %2646 = dma.hbm_to_vmem [thread:$0]  (!%p4602_p4), %s4601_s3, 128, %s4079_s4, [#allocation7]  }
 0x1a1   : > { %s3487_s23 = smov [#allocation8]   ;;  %s3488_s16 = smov [#allocation9]  }
 0x1a2   : > { %s502_s6 = sshll.u32 %s3487_s23, 4  ;;  %s513_s19 = sshll.u32 %s3488_s16, 4  ;;  %s503_s6 = int_to_ptr.vmem [resolvable:$true] %s502_s6  ;;  %s514_s19 = int_to_ptr.vmem [resolvable:$true] %s513_s19 }
 0x1a3   : > { %s4604_s1 = sld [smem:[#allocation44_spill]] }
 0x1a9   : > { %s3248_s9 = scalar_lea.hbm %s4604_s1, 16 }
 0x1aa   : > { %p3249_p6 = scmp.ne.s32.totalorder %s4604_s1, %s3248_s9  ;;  %p3255_p13 = scmp.lt.u32.totalorder %s3248_s9, %s4604_s1 }
 0x1ac   : > { %p3251_p2 = pnand %p3249_p6, %p4120_p1 }
 0x1ae   : > { %p3252_p5 = pneg %p3251_p2 }
 0x1b0   : > { %p3257_p0 = pnand %p3255_p13, %p3252_p5 }
 0x1b2   : > { %3260 = shalt.err (!%p3257_p0)
}
 0x1b3   : > { %s3261_s4 = scalar_lea.vmem %s503_s6, 16  ;;  %s3268_s18 = scalar_lea.vmem %s503_s6, 32 }
 0x1b4   : > { %p3262_p10 = scmp.ne.s32.totalorder %s503_s6, %s3261_s4  ;;  %p3269_p7 = scmp.lt.s32.totalorder %s503_s6, %s503_s6 }
 0x1b5   : > { %p3270_p12 = scmp.lt.s32.totalorder %s3268_s18, %s3261_s4 }
 0x1b6   : > { %p3264_p8 = pnand %p3262_p10, %p4120_p1 }
 0x1b7   : > { %p3271_p11 = por %p3270_p12, %p3269_p7 }
 0x1b8   : > { %p3265_p3 = pneg %p3264_p8 }
 0x1ba   : > { %p3272_p9 = pnand %p3271_p11, %p3265_p3 }
 0x1bc   : > { %3275 = shalt.err (!%p3272_p9)
}
 0x1bd   : > { %2649 = dma.hbm_to_vmem [thread:$0]  (!%p4602_p4), %s4604_s1, 16, %s503_s6, [#allocation7]  }
 0x1be   : > { %s2393_s12 = sshll.u32 %s3725_s20, 6  ;;  %s4605_s22 = sld [smem:[#allocation45_spill]] }
 0x1c4   : > { %s4606_s8 = smov %s4605_s22  ;;  %s3276_s9 = scalar_lea.hbm %s4605_s22, 16 }
 0x1c5   : > { %p3277_p6 = scmp.ne.s32.totalorder %s4606_s8, %s3276_s9  ;;  %p3283_p2 = scmp.lt.u32.totalorder %s3276_s9, %s4606_s8 }
 0x1c7   : > { %p3279_p9 = pnand %p3277_p6, %p4120_p1 }
 0x1c9   : > { %p3280_p11 = pneg %p3279_p9 }
 0x1cb   : > { %p3285_p5 = pnand %p3283_p2, %p3280_p11 }
 0x1cd   : > { %3288 = shalt.err (!%p3285_p5)
}
 0x1ce   : > { %s3289_s6 = scalar_lea.vmem %s514_s19, 16  ;;  %s3296_s20 = scalar_lea.vmem %s514_s19, 32 }
 0x1cf   : > { %p3290_p13 = scmp.ne.s32.totalorder %s514_s19, %s3289_s6  ;;  %p3297_p8 = scmp.lt.s32.totalorder %s514_s19, %s514_s19 }
 0x1d0   : > { %p3298_p3 = scmp.lt.s32.totalorder %s3296_s20, %s3289_s6 }
 0x1d1   : > { %p3292_p0 = pnand %p3290_p13, %p4120_p1 }
 0x1d2   : > { %p3299_p7 = por %p3298_p3, %p3297_p8 }
 0x1d3   : > { %p3293_p10 = pneg %p3292_p0 }
 0x1d5   : > { %p3300_p12 = pnand %p3299_p7, %p3293_p10 }
 0x1d7   : > { %3303 = shalt.err (!%p3300_p12)
}
 0x1d8   : > { %2652 = dma.hbm_to_vmem [thread:$0]  (!%p4602_p4), %s4606_s8, 16, %s514_s19, [#allocation10]  }
 0x1d9   : > { %s2454_s11 = sshll.u32 %s3460_s29, 10  ;;  %s4607_s7 = sld [smem:[#allocation56_spill]] }
 0x1da   : > { %s745_s9 = scalar_lea.vmem [#allocation22], %s2393_s12  ;;  %p4608_p6 = scmp.ne.s32.totalorder %s4572_s27, 0 }
 0x1db   : > { %s752_s30 = sshll.u32 %s745_s9, 4  ;;  %s4184_s30 = int_to_ptr.vmem [resolvable:$true] %s752_s30 }
 0x1df   : > { %s4182_s22 = scalar_lea.hbm %s4607_s7, %s2454_s11  ;;  %s3309_s18 = scalar_lea.hbm %s4607_s7, 2048 }
 0x1e0   : > { %s3304_s5 = scalar_lea.hbm %s4182_s22, 1024  ;;  %p3310_p4 = scmp.lt.u32.totalorder %s4182_s22, %s4607_s7 }
 0x1e1   : > { %p3305_p1 = scmp.ne.s32.totalorder %s4182_s22, %s3304_s5  ;;  %p3311_p2 = scmp.lt.u32.totalorder %s3309_s18, %s3304_s5 }
 0x1e2   : > { %p3313_p13 = scmp.lt.u32.totalorder %s3304_s5, %s4182_s22 }
 0x1e3   : > { %p3307_p9 = pnand %p3305_p1, %p4608_p6  ;;  %p3312_p5 = por %p3311_p2, %p3310_p4 }
 0x1e5   : > { %p3308_p11 = pneg %p3307_p9  ;;  %p3314_p0 = por %p3313_p13, %p3312_p5 }
 0x1e7   : > { %p3315_p10 = pnand %p3314_p0, %p3308_p11 }
 0x1e9   : > { %3318 = shalt.err (!%p3315_p10)
}
 0x1ea   : > { %s3319_s12 = scalar_lea.vmem %s4184_s30, 1024  ;;  %s3489_s3 = smov [#allocation22]  }
 0x1eb   : > { %p3320_p8 = scmp.ne.s32.totalorder %s4184_s30, %s3319_s12  ;;  %s3324_s10 = sshll.u32 %s3489_s3, 4  ;;  %s3325_s10 = int_to_ptr.vmem [resolvable:$false] %s3324_s10 }
 0x1ec   : > { %s3326_s11 = scalar_lea.vmem %s3325_s10, 2048  ;;  %p3327_p12 = scmp.lt.s32.totalorder %s4184_s30, %s3325_s10 }
 0x1ed   : > { %p3322_p3 = pnand %p3320_p8, %p4608_p6  ;;  %p3328_p1 = scmp.lt.s32.totalorder %s3326_s11, %s3319_s12 }
 0x1ef   : > { %p3323_p7 = pneg %p3322_p3  ;;  %p3329_p9 = por %p3328_p1, %p3327_p12 }
 0x1f1   : > { %p3330_p4 = pnand %p3329_p9, %p3323_p7 }
 0x1f3   : > { %3333 = shalt.err (!%p3330_p4)
}
 0x1f4   : > { %p4609_p11 = scmp.ne.s32.totalorder %s4570_s14, 0  ;;  %s4610_s23 = smov 4  }
 0x1f5   : > { %s4611_s16 = smov 64   ;;  %p4612_p6 = scmp.ne.s32.totalorder %s4596_s26, 0 }
 0x1f6   : > { %2692 = dma.hbm_to_vmem [thread:$0]  (!%p4609_p11), %s4182_s22, 1024, %s4184_s30, %s3733_s21, %s4611_s16, %s4611_s16, %s4610_s23  }
 0x1f7   : > { %764 = sbr.rel (%p4612_p6) target bundleno = 5506 (0x1582), region = 84  ;;  %s766_s27 = sand.u32 (!%p4612_p6), 1, %s3646_s17  }
 0x1f8   : > { %s768_s9 = sand.u32 (!%p4612_p6), 1, %s3444_s25   ;;  %s767_s14 = scalar_lea.sflag (!%p4612_p6), [#allocation4], %s766_s27 }
 0x1f9   : > { %s4217_s5 = sshll.u32 (!%p4612_p6), %s768_s9, 3  ;;  %p4613_p2 = scmp.ne.s32.totalorder (!%p4612_p6), %s4593_s2, 0 }
 0x1fa   : > { %s770_s19 = scalar_lea.vmem (!%p4612_p6), [#allocation3], %s4217_s5 }
 0x1fe   : > { %3407 = dma.done.wait (%p4613_p2), %s767_s14, 128  }
 0x1ff   : > { %3409 = vsyncadd (%p4613_p2), %s767_s14, 4294967168  ;;  %p4614_p5 = scmp.eq.s32.totalorder %s3646_s17, 0 }
 0x201   : > { %3411 = dma.done.wait (%p4614_p5), [#allocation7], 144   ;;  %p4615_p13 = pmov %p4614_p5 }
 0x202   : > { %p4616_p0 = pmov %p4614_p5 }
 0x203   : > { %3413 = vsyncadd (%p4615_p13), [#allocation7], 4294967152 }
 0x204   : > { %3415 = dma.done.wait (%p4616_p0), [#allocation10], 16   ;;  %p4617_p10 = pmov %p4616_p0 }
 0x205   : > { %s4618_s21 = sld [smem:[#allocation30_spill]]  ;;  %p4619_p8 = scmp.ne.s32.totalorder %s4595_s28, 0 }
 0x206   : > { %3417 = vsyncadd (%p4617_p10), [#allocation10], 4294967280 }
 0x20b   : > { %s4233_s26 = sand.u32 1, %s4618_s21  }
 0x20c   : > { %s790_s22 = scalar_lea.vmem [#allocation11], %s4233_s26 }
 0x20d   : > { %3419 = dma.done.wait (%p4619_p8), %s767_s14, 2176  }
 0x20e   : > { %3421 = vsyncadd (%p4619_p8), %s767_s14, 4294965120  ;;  %s2401_s17 = sshll.u32 %s4233_s26, 4  ;;  %s2403_s2 = sshll.u32 %s4233_s26, 5 }
 0x20f   : > { %s2404_s30 = sshll.u32 %s4233_s26, 6  ;;  %s798_s4 = scalar_lea.vmem [#allocation12], %s4233_s26 }
 0x210   : > { %s4244_s18 = scalar_lea.vmem [#allocation13], %s2401_s17  ;;  %s4246_s6 = scalar_lea.vmem [#allocation14], %s2401_s17 }
 0x211   : > { %s824_s28 = scalar_lea.vmem [#allocation15], %s4233_s26  ;;  %s832_s20 = scalar_lea.vmem [#allocation16], %s4233_s26 }
 0x212   : > { %s840_s12 = scalar_lea.vmem [#allocation17], %s4233_s26  ;;  %s848_s3 = scalar_lea.vmem [#allocation18], %s4233_s26 }
 0x213   : > { %s4252_s10 = scalar_lea.vmem [#allocation19], %s2403_s2  ;;  %s865_s11 = scalar_lea.vmem [#allocation20], %s4233_s26 }
 0x214   : > { %s873_s23 = scalar_lea.vmem [#allocation21], %s4233_s26  ;;  %s4256_s16 = scalar_lea.vmem [#allocation22], %s2404_s30 }
 0x215   : > { %s982_s27 = scalar_lea.vmem [#allocation23], %s4217_s5  ;;  %s4620_s14 = sld [smem:[#allocation33_spill]] }
 0x21b   : > { %p2406_p3 = scmp.ne.s32.totalorder %s4620_s14, 0 }
 0x21c   : > { %v988_v0 = vld [vmem:[%s770_s19] sm:$0xff] (!%p2406_p3)  ;;  %v989_v1 = vld [vmem:[#allocation6] sm:$0xff] (!%p2406_p3)  ;;  %vm993_vm0 = vcmask (!%p2406_p3), 261120   ;;  %v2407_v13 = vld [vmem:[#allocation8] ss:$0 sm:$0xff] (!%p2406_p3) }
 0x21d   : > { %987 = sbr.rel (%p2406_p3) target bundleno = 857 (0x359), region = 152  ;;  %v990_v2 = vadd.f32 (!%p2406_p3), %v989_v1, %v988_v0  ;;  %v2408_v15 = vld [vmem:[#allocation9] ss:$0 sm:$0xff] (!%p2406_p3) }
 0x21f   : > { %v994_v3 = vsel (!%p2406_p3), %vm993_vm0, %v990_v2, 0.0 }
 0x220   : > { %995 = vadd.xlane.f32.xlu0 (!%p2406_p3), %v994_v3 }
 0x2ad   : > { %v996_v4 = vpop.xlane.xlu0 %995 }
 0x2ae   : > { %v998_v5 = vmul.f32 0.03125, %v996_v4 }
 0x2b0   : > { %v999_v6 = vsub.f32 %v990_v2, %v998_v5 }
 0x2b2   : > { %v1000_v7 = vmul.f32 %v999_v6, %v999_v6 }
 0x2b4   : > { %v1001_v8 = vsel %vm993_vm0, %v1000_v7, 0.0 }
 0x2b5   : > { %1002 = vadd.xlane.f32.xlu0 %v1001_v8 }
 0x342   : > { %v1003_v9 = vpop.xlane.xlu0 %1002 }
 0x343   : > { %v1004_v10 = vmul.f32 0.03125, %v1003_v9 }
 0x345   : > { %v1005_v11 = vadd.f32 1e-05, %v1004_v10 }
 0x347   : > { %2814 = vrsqrt.f32 %v1005_v11 }
 0x351   : > { %v2815_v12 = vpop.eup %2814 }
 0x352   : > { %v1007_v14 = vmul.f32 %v2815_v12, %v999_v6 }
 0x354   : > { %v1014_v16 = vmul.f32 %v2407_v13, %v1007_v14 }
 0x356   : > { %v1021_v17 = vadd.f32 %v2408_v15, %v1014_v16 }
 0x358   : > { %1022 = vst.msk [vmem:[#allocation2] sm:$0xff] %vm993_vm0, %v1021_v17 }
 0x359 PF: > { %vm1026_vm1 = vcmask 261120   ;;  %v2816_v25 = vld [vmem:[%s4244_s18] sm:$0xff]   ;;  %v3490_v26 = vmov 0.0   ;;  %vm3491_vm2 = vmmov 0   ;;  %v2817_v27 = vld [vmem:[%s4244_s18 + $0x8] sm:$0xff]   ;;  %s3492_s19 = smov 64  }
 0x35a   : > { %2491 = vmatprep.subr.bf16.mxu1 %v3490_v26  ;;  %2495 = vmatprep.mubr.msk.bf16.mxu1 %vm3491_vm2, %v3490_v26  ;;  %v2409_v32 = vld [vmem:[%s790_s22] ss:$0 sm:$0xff]  ;;  %s3493_s21 = smov 96   ;;  %vm1123_vm3 = vcmask 64512   ;;  %vm1187_vm4 = vcmask 1043456   ;;  %s3494_s22 = smov 88  }
 0x35b   : > { %2492 = vmatpush3.bf16.msra.mxu1 %v2816_v25  ;;  %2517 = vmatprep.subr.bf16.mxu0 %v3490_v26  ;;  %v2410_v34 = vld [vmem:[%s798_s4] ss:$0 sm:$0xff]  ;;  %s3495_s17 = smov 120   ;;  %s3496_s2 = smov 56  }
 0x35c   : > { %2493 = vmatprep.subr.bf16.mxu1 %v3490_v26  ;;  %2519 = vmatprep.mubr.msk.bf16.mxu0 %vm3491_vm2, %v3490_v26  ;;  %s3497_s30 = smov 80   ;;  %s3498_s4 = smov 112  }
 0x35d   : > { %s3499_s18 = smov 48   ;;  %s3500_s14 = smov 72  }
 0x35f   : > { %v4263_v18 = vld [vmem:[#allocation2] sm:$0xff]  ;;  %2494 = vmatpush3.bf16.msra.mxu1 %v2817_v27  ;;  %v1116_v27 = vld [vmem:[%s4246_s6 + $0x4] sm:$0xf] }
 0x360   : > { %v1027_v19 = vsel %vm1026_vm1, %v4263_v18, 0.0  ;;  %2499 = vmatprep.subr.bf16.mxu1 %v3490_v26 }
 0x361   : > { %1028 = vadd.xlane.f32.xlu0 %v1027_v19 }
 0x3ee   : > { %v1029_v20 = vpop.xlane.xlu0 %1028 }
 0x3ef   : > { %v1031_v21 = vmul.f32 0.03125, %v1029_v20 }
 0x3f1   : > { %v1032_v22 = vsub.f32 %v4263_v18, %v1031_v21 }
 0x3f3   : > { %v1033_v23 = vmul.f32 %v1032_v22, %v1032_v22 }
 0x3f5   : > { %v1034_v24 = vsel %vm1026_vm1, %v1033_v23, 0.0 }
 0x3f6   : > { %1035 = vadd.xlane.f32.xlu0 %v1034_v24 }
 0x483   : > { %v1036_v28 = vpop.xlane.xlu0 %1035 }
 0x484   : > { %v1037_v29 = vmul.f32 0.03125, %v1036_v28  ;;  %v1347_v28 = vsel %vm1187_vm4, %v1116_v27, 0 }
 0x486   : > { %v1038_v30 = vadd.f32 1e-05, %v1037_v29  ;;  %v1115_v29 = vld [vmem:[%s4246_s6] sm:$0xf] }
 0x488   : > { %2832 = vrsqrt.f32 %v1038_v30 }
 0x492   : > { %v2833_v31 = vpop.eup %2832 }
 0x493   : > { %v1040_v33 = vmul.f32 %v2833_v31, %v1032_v22 }
 0x495   : > { %v1047_v35 = vmul.f32 %v2409_v32, %v1040_v33  ;;  %v1393_v33 = vsel %vm1187_vm4, %v1115_v29, 0 }
 0x497   : > { %v1054_v36 = vadd.f32 %v2410_v34, %v1047_v35 }
 0x499   : > { %v1055_v37 = vpack.c.bf16 %v1054_v36, %v1054_v36 }
 0x49b   : > { %2496 = vmatmul.mubr.msk.bf16.vlgmr.msra.gmra.mrb[0].mxu1 %vm1026_vm1, %v1055_v37 }
 0x49c   : > { %2501 = vmatprep.mubr.msk.bf16.mxu1 %vm3491_vm2, %v3490_v26 }
 0x56e   : > { %v1109_v38 = vpop.f32.mrb[0].mxu1 }
 0x56f   : > { %v4286_v39 = vpack.c.bf16 %v1109_v38, %v1109_v38  ;;  %v2497_v40 = vpop.f32.mrb[1].mxu1 }
 0x570   : > { %v1112_v41 = vpop.f32.mrb[2].mxu1 }
 0x571   : > { %1182 = vrot.lane.b32.xlu0 %v4286_v39, %s3492_s19  ;;  %1121 = vrot.lane.b32.xlu1 %v4286_v39, %s3493_s21  ;;  %v2498_v42 = vpop.f32.mrb[3].mxu1  ;;  %s3501_s19 = smov 104   ;;  %s3502_s21 = smov 40  }
 0x5e3   : > { %v1122_v43 = vpop.permute.xlu1 %1121  ;;  %v1183_v45 = vpop.permute.xlu0 %1182 }
 0x5e4   : > { %v1128_v44 = vsel %vm1123_vm3, %v1122_v43, 0  ;;  %v1189_v46 = vsel %vm1187_vm4, %v1183_v45, 0 }
 0x5e5   : > { %2500 = vmatpush3.bf16.xpose.msra.mxu1 %v1128_v44 }
 0x5e6   : > { %2505 = vmatprep.subr.bf16.mxu1 %v3490_v26 }
 0x5ec   : > { %2502 = vmatmul.mubr.msk.bf16.vlgmr.msra.gmra.mrb[4].mxu1 %vm1123_vm3, %v4286_v39 }
 0x5ed   : > { %2506 = vmatpush3.bf16.msra.mxu1 %v1189_v46  ;;  %2507 = vmatprep.mubr.msk.bf16.mxu1 %vm3491_vm2, %v3490_v26 }
 0x5ee   : > { %2511 = vmatprep.subr.bf16.mxu1 %v3490_v26 }
 0x6bf   : > { %v1164_v47 = vpop.f32.mrb[4].mxu1 }
 0x6c0   : > { %v2503_v48 = vpop.f32.mrb[5].mxu1  ;;  %v1170_v49 = vsel %vm1123_vm3, %v1164_v47, -inf }
 0x6c1   : > { %1171 = vmax.xlane.f32.xlu1 %v1170_v49  ;;  %v1167_v50 = vpop.f32.mrb[6].mxu1 }
 0x6c2   : > { %v2504_v51 = vpop.f32.mrb[7].mxu1 }
 0x74e   : > { %v1172_v52 = vpop.xlane.xlu1 %1171 }
 0x74f   : > { %v1173_v53 = vsub.f32 %v1164_v47, %v1172_v52 }
 0x751   : > { %v1174_v54 = vmul.f32 1.442695, %v1173_v53 }
 0x753   : > { %2834 = vpow2.f32 %v1174_v54 }
 0x75d   : > { %v2835_v55 = vpop.eup %2834 }
 0x75e   : > { %v1176_v56 = vsel %vm1123_vm3, %v2835_v55, 0.0 }
 0x75f   : > { %1177 = vadd.xlane.f32.xlu0 %v1176_v56 }
 0x775   : > { %1234 = vrot.lane.b32.xlu0 %v4286_v39, %s3494_s22 }
 0x779   : > { %1232 = vrot.lane.b32.xlu0 %v4286_v39, %s3495_s17 }
 0x7ec   : > { %v1178_v57 = vpop.xlane.xlu0 %1177 }
 0x7ed   : > { %2836 = vrcp.f32 %v1178_v57 }
 0x7f0   : > { %v1235_v60 = vpop.permute.xlu0 %1234 }
 0x7f1   : > { %v1240_v62 = vsel %vm1123_vm3, %v1235_v60, 0 }
 0x7f4   : > { %v1233_v63 = vpop.permute.xlu0 %1232 }
 0x7f7   : > { %v2837_v58 = vpop.eup %2836 }
 0x7f8   : > { %v1180_v59 = vmul.f32 %v2837_v58, %v2835_v55  ;;  %v1117_v55 = vld [vmem:[%s4246_s6 + $0x8] sm:$0xf] }
 0x7f9   : > { %v1550_v56 = vsel %vm1187_vm4, %v1117_v55, 0 }
 0x7fa   : > { %v1181_v61 = vpack.c.bf16 %v1180_v59, %v1180_v59 }
 0x7fc   : > { %2508 = vmatmul.mubr.msk.bf16.vlgmr.msra.gmra.mrb[8].mxu1 %vm1123_vm3, %v1181_v61 }
 0x7fd   : > { %2512 = vmatpush3.bf16.xpose.msra.mxu1 %v1240_v62  ;;  %2513 = vmatprep.mubr.msk.bf16.mxu1 %vm3491_vm2, %v3490_v26 }
 0x7fe   : > { %2523 = vmatprep.subr.bf16.mxu1 %v3490_v26 }
 0x804   : > { %2514 = vmatmul.mubr.msk.bf16.vlgmr.msra.gmra.mrb[12].mxu1 %vm1123_vm3, %v1233_v63 }
 0x805   : > { %2525 = vmatprep.mubr.msk.bf16.mxu1 %vm3491_vm2, %v3490_v26  ;;  %2524 = vmatpush3.bf16.msra.mxu1 %v1347_v28 }
 0x806   : > { %2529 = vmatprep.subr.bf16.mxu1 %v3490_v26 }
 0x8cf   : > { %v4310_v0 = vpop.f32.mrb[8].mxu1 }
 0x8d0   : > { %v2509_v1 = vpop.f32.mrb[9].mxu1  ;;  %v1231_v42 = vpack.c.bf16 %v4310_v0, %v4310_v0 }
 0x8d1   : > { %v1228_v2 = vpop.f32.mrb[10].mxu1 }
 0x8d2   : > { %v2510_v3 = vpop.f32.mrb[11].mxu1 }
 0x8d7   : > { %v1276_v4 = vpop.f32.mrb[12].mxu1 }
 0x8d8   : > { %v2515_v5 = vpop.f32.mrb[13].mxu1  ;;  %v1282_v6 = vsel %vm1123_vm3, %v1276_v4, -inf }
 0x8d9   : > { %1283 = vmax.xlane.f32.xlu1 %v1282_v6  ;;  %v1279_v7 = vpop.f32.mrb[14].mxu1 }
 0x8da   : > { %v2516_v8 = vpop.f32.mrb[15].mxu1 }
 0x8ea   : > { %1294 = vrot.lane.b32.xlu1 %v4286_v39, %s3496_s2 }
 0x8ee   : > { %1437 = vrot.lane.b32.xlu1 %v4286_v39, %s3497_s30 }
 0x8f2   : > { %1435 = vrot.lane.b32.xlu1 %v4286_v39, %s3498_s4 }
 0x966   : > { %v1284_v9 = vpop.xlane.xlu1 %1283 }
 0x967   : > { %v1285_v10 = vsub.f32 %v1276_v4, %v1284_v9 }
 0x969   : > { %v1286_v11 = vmul.f32 1.442695, %v1285_v10 }
 0x96a   : > { %v1295_v12 = vpop.permute.xlu1 %1294 }
 0x96b   : > { %2838 = vpow2.f32 %v1286_v11  ;;  %v1300_v13 = vsel %vm1187_vm4, %v1295_v12, 0  ;;  %v1118_v12 = vld [vmem:[%s4246_s6 + $0xc] sm:$0xf]  ;;  %s4621_s6 = sld [smem:[#allocation33_spill]] }
 0x96c   : > { %2518 = vmatpush3.bf16.msra.mxu0 %v1300_v13 }
 0x96d   : > { %2535 = vmatprep.subr.bf16.mxu0 %v3490_v26 }
 0x96e   : > { %v1438_v20 = vpop.permute.xlu1 %1437 }
 0x96f   : > { %v1443_v22 = vsel %vm1123_vm3, %v1438_v20, 0 }
 0x971   : > { %p2446_p7 = scmp.ne.s32.totalorder %s4621_s6, 1 }
 0x972   : > { %v1436_v24 = vpop.permute.xlu1 %1435 }
 0x975   : > { %v2839_v14 = vpop.eup %2838 }
 0x976   : > { %v1288_v15 = vsel %vm1123_vm3, %v2839_v14, 0.0 }
 0x977   : > { %1289 = vadd.xlane.f32.xlu0 %v1288_v15 }
 0x98d   : > { %1497 = vrot.lane.b32.xlu0 %v4286_v39, %s3499_s18 }
 0xa04   : > { %v1290_v16 = vpop.xlane.xlu0 %1289 }
 0xa05   : > { %2840 = vrcp.f32 %v1290_v16 }
 0xa08   : > { %v1498_v23 = vpop.permute.xlu0 %1497 }
 0xa09   : > { %v1503_v25 = vsel %vm1187_vm4, %v1498_v23, 0 }
 0xa0f   : > { %v2841_v17 = vpop.eup %2840 }
 0xa10   : > { %v1292_v19 = vmul.f32 %v2841_v17, %v2839_v14  ;;  %v1708_v14 = vsel %vm1187_vm4, %v1118_v12, 0 }
 0xa12   : > { %v1293_v21 = vpack.c.bf16 %v1292_v19, %v1292_v19 }
 0xa14   : > { %2520 = vmatmul.mubr.msk.bf16.vlgmr.msra.gmra.mrb[0].mxu0 %vm1123_vm3, %v1293_v21 }
 0xa15   : > { %2536 = vmatpush3.bf16.xpose.msra.mxu0 %v1443_v22  ;;  %2537 = vmatprep.mubr.msk.bf16.mxu0 %vm3491_vm2, %v3490_v26 }
 0xa16   : > { %2541 = vmatprep.subr.bf16.mxu0 %v3490_v26 }
 0xa1c   : > { %2538 = vmatmul.mubr.msk.bf16.vlgmr.msra.gmra.mrb[4].mxu0 %vm1123_vm3, %v1436_v24 }
 0xa1d   : > { %2542 = vmatpush3.bf16.msra.mxu0 %v1503_v25  ;;  %2543 = vmatprep.mubr.msk.bf16.mxu0 %vm3491_vm2, %v3490_v26 }
 0xa1e   : > { %2553 = vmatprep.subr.bf16.mxu0 %v3490_v26 }
 0xae7   : > { %v1336_v30 = vpop.f32.mrb[0].mxu0 }
 0xae8   : > { %v1342_v31 = vpack.c.bf16 %v1336_v30, %v1336_v30  ;;  %v2521_v32 = vpop.f32.mrb[1].mxu0 }
 0xae9   : > { %v1339_v34 = vpop.f32.mrb[2].mxu0 }
 0xaea   : > { %v2522_v35 = vpop.f32.mrb[3].mxu0  ;;  %2526 = vmatmul.mubr.msk.bf16.vlgmr.msra.gmra.mrb[16].mxu1 %vm1123_vm3, %v1342_v31 }
 0xaeb   : > { %2530 = vmatpush3.bf16.msra.mxu1 %v1393_v33  ;;  %2531 = vmatprep.mubr.msk.bf16.mxu1 %vm3491_vm2, %v3490_v26 }
 0xaec   : > { %2547 = vmatprep.subr.bf16.mxu1 %v3490_v26 }
 0xaef   : > { %v1479_v36 = vpop.f32.mrb[4].mxu0 }
 0xaf0   : > { %v2539_v37 = vpop.f32.mrb[5].mxu0  ;;  %v1485_v38 = vsel %vm1123_vm3, %v1479_v36, -inf }
 0xaf1   : > { %1486 = vmax.xlane.f32.xlu1 %v1485_v38  ;;  %v1482_v40 = vpop.f32.mrb[6].mxu0  ;;  %v2427_v38 = vld [vmem:[%s832_s20] ss:$0 sm:$0xff] }
 0xaf2   : > { %v2540_v41 = vpop.f32.mrb[7].mxu0 }
 0xaf6   : > { %2532 = vmatmul.mubr.msk.bf16.vlgmr.msra.gmra.mrb[16].mxu1 %vm1123_vm3, %v1231_v42 }
 0xaf7   : > { %2549 = vmatprep.mubr.msk.bf16.mxu1 %vm3491_vm2, %v3490_v26  ;;  %2548 = vmatpush3.bf16.msra.mxu1 %v1550_v56 }
 0xaf8   : > { %2559 = vmatprep.subr.bf16.mxu1 %v3490_v26 }
 0xb7e   : > { %v1487_v43 = vpop.xlane.xlu1 %1486 }
 0xb7f   : > { %v1488_v44 = vsub.f32 %v1479_v36, %v1487_v43  ;;  %v2426_v36 = vld [vmem:[%s824_s28] ss:$0 sm:$0xff] }
 0xb81   : > { %v1489_v45 = vmul.f32 1.442695, %v1488_v44 }
 0xb83   : > { %2842 = vpow2.f32 %v1489_v45 }
 0xb8d   : > { %v2843_v46 = vpop.eup %2842 }
 0xb8e   : > { %v1491_v47 = vsel %vm1123_vm3, %v2843_v46, 0.0 }
 0xb8f   : > { %1492 = vadd.xlane.f32.xlu0 %v1491_v47 }
 0xba5   : > { %1595 = vrot.lane.b32.xlu0 %v4286_v39, %s3500_s14 }
 0xba9   : > { %1593 = vrot.lane.b32.xlu0 %v4286_v39, %s3501_s19 }
 0xc1c   : > { %v1493_v48 = vpop.xlane.xlu0 %1492 }
 0xc1d   : > { %2844 = vrcp.f32 %v1493_v48 }
 0xc20   : > { %v1596_v51 = vpop.permute.xlu0 %1595 }
 0xc21   : > { %v1601_v53 = vsel %vm1123_vm3, %v1596_v51, 0  ;;  %v2823_v51 = vld [vmem:[%s4252_s10 + $0x14] ss:$8 sps:$4 sm:$0xff]  }
 0xc24   : > { %v1594_v54 = vpop.permute.xlu0 %1593 }
 0xc27   : > { %v2845_v49 = vpop.eup %2844 }
 0xc28   : > { %v1495_v50 = vmul.f32 %v2845_v49, %v2843_v46  ;;  %v2820_v49 = vld [vmem:[%s4252_s10 + $0x4] ss:$8 sps:$4 sm:$0xff]  }
 0xc2a   : > { %v1496_v52 = vpack.c.bf16 %v1495_v50, %v1495_v50  ;;  %v2818_v50 = vld [vmem:[%s4252_s10] ss:$8 sps:$4 sm:$0xff]  }
 0xc2c   : > { %2544 = vmatmul.mubr.msk.bf16.vlgmr.msra.gmra.mrb[8].mxu0 %vm1123_vm3, %v1496_v52  ;;  %v3503_v52 = vmov 0  }
 0xc2d   : > { %2554 = vmatpush3.bf16.xpose.msra.mxu0 %v1601_v53  ;;  %2555 = vmatprep.mubr.msk.bf16.mxu0 %vm3491_vm2, %v3490_v26 }
 0xc2e   : > { %1838 = vmatprep.subr.bf16.mxu0 %v2820_v49 }
 0xc34   : > { %2556 = vmatmul.mubr.msk.bf16.vlgmr.msra.gmra.mrb[12].mxu0 %vm1123_vm3, %v1594_v54 }
 0xc35   : > { %1839 = vmatpush1.bf16.msra.mxu0 %v2818_v50  ;;  %1870 = vmatprep.mubr.bf16.mxu0 %v3503_v52 }
 0xc36   : > { %1840 = vmatprep.subr.bf16.mxu0 %v2823_v51 }
 0xcff   : > { %v1539_v57 = vpop.f32.mrb[8].mxu0 }
 0xd00   : > { %v1545_v58 = vpack.c.bf16 %v1539_v57, %v1539_v57  ;;  %v2545_v59 = vpop.f32.mrb[9].mxu0  ;;  %v2428_v57 = vld [vmem:[%s840_s12] ss:$0 sm:$0xff] }
 0xd01   : > { %v1542_v60 = vpop.f32.mrb[10].mxu0  ;;  %v2429_v59 = vld [vmem:[%s848_s3] ss:$0 sm:$0xff] }
 0xd02   : > { %v2546_v61 = vpop.f32.mrb[11].mxu0  ;;  %2550 = vmatmul.mubr.msk.bf16.vlgmr.msra.gmra.mrb[16].mxu1 %vm1123_vm3, %v1545_v58 }
 0xd03   : > { %2561 = vmatprep.mubr.msk.bf16.mxu1 %vm3491_vm2, %v3490_v26 }
 0xd07   : > { %v1637_v62 = vpop.f32.mrb[12].mxu0 }
 0xd08   : > { %v2557_v63 = vpop.f32.mrb[13].mxu0  ;;  %v1643_v0 = vsel %vm1123_vm3, %v1637_v62, -inf }
 0xd09   : > { %1644 = vmax.xlane.f32.xlu1 %v1643_v0  ;;  %v1640_v1 = vpop.f32.mrb[14].mxu0 }
 0xd0a   : > { %v2558_v2 = vpop.f32.mrb[15].mxu0 }
 0xd1a   : > { %1655 = vrot.lane.b32.xlu1 %v4286_v39, %s3502_s21 }
 0xd96   : > { %v1645_v3 = vpop.xlane.xlu1 %1644 }
 0xd97   : > { %v1646_v4 = vsub.f32 %v1637_v62, %v1645_v3 }
 0xd99   : > { %v1647_v5 = vmul.f32 1.442695, %v1646_v4 }
 0xd9a   : > { %v1656_v6 = vpop.permute.xlu1 %1655 }
 0xd9b   : > { %2846 = vpow2.f32 %v1647_v5  ;;  %v1661_v7 = vsel %vm1187_vm4, %v1656_v6, 0 }
 0xd9c   : > { %2560 = vmatpush3.bf16.msra.mxu1 %v1661_v7 }
 0xd9d   : > { %2565 = vmatprep.subr.bf16.mxu1 %v3490_v26 }
 0xda5   : > { %v2847_v8 = vpop.eup %2846 }
 0xda6   : > { %v1649_v9 = vsel %vm1123_vm3, %v2847_v8, 0.0 }
 0xda7   : > { %1650 = vadd.xlane.f32.xlu0 %v1649_v9  ;;  %v2824_v9 = vld [vmem:[%s4256_s16] sm:$0xff]  }
 0xe34   : > { %v1651_v10 = vpop.xlane.xlu0 %1650 }
 0xe35   : > { %2848 = vrcp.f32 %v1651_v10  ;;  %v2825_v10 = vld [vmem:[%s4256_s16 + $0x8] sm:$0xff]  }
 0xe3f   : > { %v2849_v11 = vpop.eup %2848 }
 0xe40   : > { %v1653_v13 = vmul.f32 %v2849_v11, %v2847_v8 }
 0xe42   : > { %v1654_v39 = vpack.c.bf16 %v1653_v13, %v1653_v13 }
 0xe44   : > { %2562 = vmatmul.mubr.msk.bf16.vlgmr.msra.gmra.mrb[20].mxu1 %vm1123_vm3, %v1654_v39 }
 0xe45   : > { %2566 = vmatpush3.bf16.msra.mxu1 %v1708_v14  ;;  %2567 = vmatprep.mubr.msk.bf16.mxu1 %vm3491_vm2, %v3490_v26  ;;  %v2826_v14 = vld [vmem:[%s4256_s16 + $0x10] sm:$0xff]  }
 0xf17   : > { %v1697_v15 = vpop.f32.mrb[20].mxu1 }
 0xf18   : > { %v1703_v16 = vpack.c.bf16 %v1697_v15, %v1697_v15  ;;  %v2563_v17 = vpop.f32.mrb[21].mxu1  ;;  %v2827_v15 = vld [vmem:[%s4256_s16 + $0x18] sm:$0xff]  }
 0xf19   : > { %v1700_v19 = vpop.f32.mrb[22].mxu1  ;;  %v2829_v17 = vld [vmem:[%s4256_s16 + $0x28] sm:$0xff]  }
 0xf1a   : > { %v2564_v20 = vpop.f32.mrb[23].mxu1  ;;  %2568 = vmatmul.mubr.msk.bf16.vlgmr.msra.gmra.mrb[16].mxu1 %vm1123_vm3, %v1703_v16  ;;  %v2828_v16 = vld [vmem:[%s4256_s16 + $0x20] sm:$0xff]   ;;  %v2830_v19 = vld [vmem:[%s4256_s16 + $0x30] sm:$0xff]  }
 0xf1b   : > { %v2831_v20 = vld [vmem:[%s4256_s16 + $0x38] sm:$0xff]  }
 0xfed   : > { %v1744_v21 = vpop.f32.mrb[16].mxu1 }
 0xfee   : > { %v2569_v22 = vpop.f32.mrb[17].mxu1  ;;  %v1753_v23 = vsel %vm1026_vm1, %v1744_v21, 0.0 }
 0xfef   : > { %1754 = vadd.xlane.f32.xlu1 %v1753_v23  ;;  %v1747_v24 = vpop.f32.mrb[18].mxu1 }
 0xff0   : > { %v2570_v25 = vpop.f32.mrb[19].mxu1 }
 0xff1   : > { %v2436_v25 = vld [vmem:[%s865_s11] ss:$0 sm:$0xff] }
0x107c   : > { %v1755_v27 = vpop.xlane.xlu1 %1754 }
0x107d   : > { %v1756_v28 = vmul.f32 0.03125, %v1755_v27 }
0x107f   : > { %v1757_v29 = vsub.f32 %v1744_v21, %v1756_v28  ;;  %v2437_v28 = vld [vmem:[%s873_s23] ss:$0 sm:$0xff] }
0x1081   : > { %v1758_v30 = vmul.f32 %v1757_v29, %v1757_v29 }
0x1083   : > { %v1759_v31 = vsel %vm1026_vm1, %v1758_v30, 0.0 }
0x1084   : > { %1760 = vadd.xlane.f32.xlu0 %v1759_v31 }
0x1111   : > { %v1761_v32 = vpop.xlane.xlu0 %1760 }
0x1112   : > { %v1762_v33 = vmul.f32 0.03125, %v1761_v32 }
0x1114   : > { %v1763_v34 = vadd.f32 1e-05, %v1762_v33 }
0x1116   : > { %2850 = vrsqrt.f32 %v1763_v34 }
0x1120   : > { %v2851_v35 = vpop.eup %2850 }
0x1121   : > { %v1765_v37 = vmul.f32 %v2851_v35, %v1757_v29 }
0x1123   : > { %v1772_v40 = vmul.f32 %v2426_v36, %v1765_v37 }
0x1125   : > { %v1779_v41 = vadd.f32 %v2427_v38, %v1772_v40 }
0x1127   : > { %v4377_v42 = vadd.f32 %v1779_v41, %v4263_v18  ;;  %v2821_v18 = vld [vmem:[%s4252_s10 + $0x10] ss:$8 sps:$4 sm:$0xff]  }
0x1128   : > { %1841 = vmatpush1.bf16.msra.mxu0 %v2821_v18 }
0x1129   : > { %v1783_v43 = vsel %vm1026_vm1, %v4377_v42, 0.0  ;;  %2571 = vmatprep.subr.bf16.mxu0 %v3490_v26 }
0x112a   : > { %1784 = vadd.xlane.f32.xlu0 %v1783_v43 }
0x11b7   : > { %v1785_v44 = vpop.xlane.xlu0 %1784 }
0x11b8   : > { %v1786_v45 = vmul.f32 0.03125, %v1785_v44 }
0x11ba   : > { %v1787_v46 = vsub.f32 %v4377_v42, %v1786_v45 }
0x11bc   : > { %v1788_v47 = vmul.f32 %v1787_v46, %v1787_v46 }
0x11be   : > { %v1789_v48 = vsel %vm1026_vm1, %v1788_v47, 0.0 }
0x11bf   : > { %1790 = vadd.xlane.f32.xlu0 %v1789_v48 }
0x124c   : > { %v1791_v53 = vpop.xlane.xlu0 %1790 }
0x124d   : > { %v1792_v54 = vmul.f32 0.03125, %v1791_v53 }
0x124f   : > { %v1793_v55 = vadd.f32 1e-05, %v1792_v54 }
0x1251   : > { %2852 = vrsqrt.f32 %v1793_v55 }
0x125b   : > { %v2853_v56 = vpop.eup %2852 }
0x125c   : > { %v1795_v58 = vmul.f32 %v2853_v56, %v1787_v46 }
0x125e   : > { %v1802_v60 = vmul.f32 %v2428_v57, %v1795_v58 }
0x1260   : > { %v1809_v61 = vadd.f32 %v2429_v59, %v1802_v60 }
0x1262   : > { %v1810_v62 = vpack.c.bf16 %v1809_v61, %v1809_v61 }
0x1264   : > { %2434 = vmatmul.mubr.msk.bf16.vlgmr.msra.gmra.mrb[16].mxu0 %vm1026_vm1, %v1810_v62 }
0x1265   : > { %2587 = vmatprep.mubr.msk.bf16.mxu0 %vm3491_vm2, %v3490_v26  ;;  %2572 = vmatpush3.bf16.msra.mxu0 %v2824_v9 }
0x1266   : > { %2573 = vmatprep.subr.bf16.mxu0 %v3490_v26 }
0x1269   : > { %2574 = vmatpush3.bf16.msra.mxu0 %v2825_v10 }
0x126a   : > { %2575 = vmatprep.subr.bf16.mxu0 %v3490_v26 }
0x126d   : > { %2576 = vmatpush3.bf16.msra.mxu0 %v2826_v14 }
0x126e   : > { %2577 = vmatprep.subr.bf16.mxu0 %v3490_v26 }
0x1271   : > { %2578 = vmatpush3.bf16.msra.mxu0 %v2827_v15 }
0x1272   : > { %2579 = vmatprep.subr.bf16.mxu0 %v3490_v26 }
0x1275   : > { %2580 = vmatpush3.bf16.msra.mxu0 %v2828_v16 }
0x1276   : > { %2581 = vmatprep.subr.bf16.mxu0 %v3490_v26 }
0x1279   : > { %2582 = vmatpush3.bf16.msra.mxu0 %v2829_v17 }
0x127a   : > { %2583 = vmatprep.subr.bf16.mxu0 %v3490_v26 }
0x127d   : > { %2584 = vmatpush3.bf16.msra.mxu0 %v2830_v19 }
0x127e   : > { %2585 = vmatprep.subr.bf16.mxu0 %v3490_v26 }
0x1281   : > { %2586 = vmatpush3.bf16.msra.mxu0 %v2831_v20 }
0x1337   : > { %v1872_v63 = vpop.f32.mrb[16].mxu0 }
0x1338   : > { %v1874_v0 = vpop.f32.mrb[17].mxu0 }
0x1339   : > { %v2435_v1 = vmul.f32 -1.442695, %v1874_v0  ;;  %v1876_v2 = vpop.f32.mrb[18].mxu0 }
0x133a   : > { %v1877_v3 = vpop.f32.mrb[19].mxu0 }
0x133b   : > { %2854 = vpow2.f32 %v2435_v1 }
0x1345   : > { %v2855_v4 = vpop.eup %2854 }
0x1346   : > { %v1882_v5 = vadd.f32 1.0, %v2855_v4 }
0x1348   : > { %2856 = vrcp.f32 %v1882_v5 }
0x1352   : > { %v2857_v6 = vpop.eup %2856 }
0x1353   : > { %v1885_v7 = vmul.f32 %v2857_v6, %v1874_v0 }
0x1355   : > { %v1886_v8 = vmul.f32 %v1885_v7, %v1872_v63 }
0x1357   : > { %1889 = vadd.xlane.f32.xlu0 %v1886_v8 }
0x13e4   : > { %v1890_v11 = vpop.xlane.xlu0 %1889 }
0x13e5   : > { %v1892_v12 = vmul.f32 0.0078125, %v1890_v11 }
0x13e7   : > { %v1893_v13 = vsub.f32 %v1886_v8, %v1892_v12 }
0x13e9   : > { %v1894_v39 = vmul.f32 %v1893_v13, %v1893_v13 }
0x13eb   : > { %1895 = vadd.xlane.f32.xlu0 %v1894_v39 }
0x1478   : > { %v1896_v21 = vpop.xlane.xlu0 %1895 }
0x1479   : > { %v1897_v22 = vmul.f32 0.0078125, %v1896_v21 }
0x147b   : > { %v1898_v23 = vadd.f32 1e-05, %v1897_v22 }
0x147d   : > { %2858 = vrsqrt.f32 %v1898_v23 }
0x1487   : > { %v2859_v24 = vpop.eup %2858 }
0x1488   : > { %v1900_v27 = vmul.f32 %v2859_v24, %v1893_v13 }
0x148a   : > { %v1907_v29 = vmul.f32 %v2436_v25, %v1900_v27 }
0x148c   : > { %v1914_v30 = vadd.f32 %v2437_v28, %v1907_v29 }
0x148e   : > { %v1915_v31 = vpack.c.bf16 %v1914_v30, %v1914_v30 }
0x1490   : > { %2588 = vmatmul.mubr.bf16.vlgmr.msra.gmra.mrb[20].mxu0 %v1915_v31 }
0x1560   : > { %2025 = sbr.rel (%p2446_p7) target bundleno = 5479 (0x1567), region = 156 }
0x1563   : > { %v2014_v32 = vpop.f32.mrb[20].mxu0 }
0x1564   : > { %v2020_v33 = vadd.f32 %v2014_v32, %v4377_v42  ;;  %v2589_v34 = vpop.f32.mrb[21].mxu0 }
0x1565   : > { %v2017_v26 = vpop.f32.mrb[22].mxu0 }
0x1566   : > { %2021 = vst.msk [vmem:[#allocation2] sm:$0xff] %vm1026_vm1, %v2020_v33  ;;  %v2590_v35 = vpop.f32.mrb[23].mxu0  ;;  %2026 = vst.msk [vmem:[%s982_s27] sm:$0xff] (!%p2446_p7), %vm1026_vm1, %v2020_v33 }
0x1567 PF: > { %s4622_s26 = sld [smem:[#allocation34_spill]]  ;;  %s4623_s28 = sld [smem:[#allocation40_spill]] }
0x1568   : > { %s4624_s10 = sld [smem:[#allocation57_spill]]  ;;  %s2041_s23 = sshll.u32 %s982_s27, 4  ;;  %s2042_s23 = int_to_ptr.vmem [resolvable:$true] %s2041_s23 }
0x1569   : > { %s2028_s16 = scalar_lea.sflag [#allocation5], %s768_s9  ;;  %s3334_s22 = scalar_lea.vmem %s2042_s23, 128 }
0x156a   : > { %p3335_p12 = scmp.ne.s32.totalorder %s2042_s23, %s3334_s22  ;;  %s3504_s17 = smov [#allocation23]  }
0x156b   : > { %s3338_s2 = sshll.u32 %s3504_s17, 4  ;;  %s3339_s2 = int_to_ptr.vmem [resolvable:$false] %s3338_s2 }
0x156c   : > { %s3340_s30 = scalar_lea.vmem %s3339_s2, 256  ;;  %p3341_p11 = scmp.lt.s32.totalorder %s2042_s23, %s3339_s2 }
0x156d   : > { %s2448_s20 = sshll.u32 %s4622_s26, 7  ;;  %p4625_p1 = scmp.ne.s32.totalorder %s4623_s28, 0 }
0x156e   : > { %s4424_s11 = scalar_lea.hbm %s4624_s10, %s2448_s20  ;;  %p3342_p6 = scmp.lt.s32.totalorder %s3340_s30, %s3334_s22 }
0x156f   : > { %p3336_p9 = pnand %p3335_p12, %p4625_p1 }
0x1570   : > { %p3343_p2 = por %p3342_p6, %p3341_p11 }
0x1571   : > { %p3337_p4 = pneg %p3336_p9 }
0x1573   : > { %p3344_p5 = pnand %p3343_p2, %p3337_p4 }
0x1575   : > { %3347 = shalt.err (!%p3344_p5)
}
0x1576   : > { %s3348_s9 = scalar_lea.hbm %s4424_s11, 128  ;;  %s3352_s4 = scalar_lea.hbm %s4624_s10, 256 }
0x1577   : > { %p3349_p13 = scmp.ne.s32.totalorder %s4424_s11, %s3348_s9  ;;  %p3353_p8 = scmp.lt.u32.totalorder %s4424_s11, %s4624_s10 }
0x1578   : > { %p3354_p3 = scmp.lt.u32.totalorder %s3352_s4, %s3348_s9  ;;  %p3356_p12 = scmp.lt.u32.totalorder %s3348_s9, %s4424_s11 }
0x1579   : > { %p3350_p0 = pnand %p3349_p13, %p4625_p1 }
0x157a   : > { %p3355_p7 = por %p3354_p3, %p3353_p8 }
0x157b   : > { %p3351_p10 = pneg %p3350_p0 }
0x157c   : > { %p3357_p9 = por %p3356_p12, %p3355_p7 }
0x157e   : > { %p3358_p4 = pnand %p3357_p9, %p3351_p10 }
0x1580   : > { %3361 = shalt.err (!%p3358_p4)
}
0x1581   : > { %2641 = dma.vmem_to_hbm [thread:$0]  (%p4625_p1), %s2042_s23, 128, %s4424_s11, %s2028_s16  }
0x1582 PF: > { %s4626_s19 = sld [smem:[#allocation41_spill]]  ;;  %p2704_p11 = scmp.ge.s32.totalorder %s3468_s0, 2 }
0x1583   : > { %s2053_s21 = sand.u32 1, %s3440_s24  }
0x1584   : > { %s2054_s6 = scalar_lea.sflag [#allocation5], %s2053_s21 }
0x1588   : > { %p4627_p6 = scmp.ne.s32.totalorder %s4626_s19, 0 }
0x158a   : > { %p2694_p2 = pnand %p2704_p11, %p4627_p6 }
0x158c   : > { %3423 = dma.done.wait (!%p2694_p2), %s2054_s6, 128  }
0x158d   : > { %3425 = vsyncadd (!%p2694_p2), %s2054_s6, 4294967168  ;;  %s34_s0 = sadd.s32 1, %s3468_s0   ;;  %s4628_s21 = sld [smem:[#allocation30_spill]] }
0x158e   : > { %p31_p5 = scmp.ge.s32.totalorder %s34_s0, 6   ;;  %s4629_s22 = sld [smem:[#allocation31_spill]] }
0x158f   : > { %s4630_s23 = sld [smem:[#allocation38_spill]]  ;;  %s4631_s26 = sld [smem:[#allocation32_spill]] }
0x1590   : > { %s4632_s28 = sld [smem:[#allocation39_spill]]  ;;  %s4633_s20 = sld [smem:[#allocation35_spill]] }
0x1591   : > { %s4634_s12 = sld [smem:[#allocation36_spill]]  ;;  %s4635_s30 = sld [smem:[#allocation37_spill]] }
0x1592   : > { %s4636_s24 = smov %s3444_s25  ;;  %s4639_s27 = smov %s3460_s29 }
0x1593   :  { %33 = sbr.rel (!%p31_p5) target bundleno = 28 (0x1c), region = 281 }
0x1595   : > { %s4637_s25 = smov %s4631_s26 }
0x1596   : > { %s4638_s26 = smov %s4632_s28  ;;  %s4640_s28 = smov %s4633_s20 }
0x1597   : > { %s4641_s29 = smov %s4634_s12 }
0x159a   :  { %2059 = vsyncpa [#allocation4], 1 }
0x159b   :  { %2061 = vsyncpa [#allocation4 + $0x1], 1 }
0x159c   :  { %2062 = vsyncpa [#allocation7], 1 }
0x159d   :  { %2063 = vsyncpa [#allocation10], 1 }
0x159e   :  { %2064 = vsyncpa [#allocation5], 1 }
0x159f   :  { %2066 = vsyncpa [#allocation5 + $0x1], 1 }

</bundles_post_ra>
